<compile_context>
chip_gen: v7x
topology: tpu7x:2x2x1
jax: 0.10.0
libtpu: 0.0.40
codegen_flags: <defaults>
</compile_context>

<pallas_src>
import numpy as np

import jax
import jax.numpy as jnp
from jax.experimental import pallas as pl
from jax.experimental.pallas import tpu as pltpu


# --------------------------------------------------------------------------
# Fused forward kernel: one grid step == one image.
# Activation layout: 2D (H, W*C) with the channel fastest within the lane dim.
# --------------------------------------------------------------------------
def _lenet_kernel(x_ref, c1m_ref, c1b_ref, c2m_ref, c2b_ref,
                  sr1_ref, sc1_ref, sr2_ref, sc2_ref,
                  f1w_ref, f1b_ref, f2w_ref, f2b_ref, f3w_ref, f3b_ref,
                  out_ref):
    f32 = jnp.float32
    x = x_ref[0]                                                     # (28, 28)

    # ---- conv1 (1->6, k5, VALID) + bias + ReLU -> z1 (24, 24*6) [h, w*6+c] ----
    acc = jnp.dot(x[0:24, :], c1m_ref[0], preferred_element_type=f32)
    for i in range(1, 5):
        acc = acc + jnp.dot(x[i:i + 24, :], c1m_ref[i],
                            preferred_element_type=f32)
    z1 = jnp.maximum(acc + c1b_ref[...], 0.0)                        # (24, 144)

    # ---- pool1 2x2/2 -> a1 (12, 12*6) ----
    rmax = jnp.maximum(z1[0:23, :], z1[1:24, :])                     # rows (h, h+1)
    ph = jnp.dot(sr1_ref[...], rmax, preferred_element_type=f32)     # even rows  (12,144)
    cmax = jnp.maximum(ph[:, 0:138], ph[:, 6:144])                   # cols (w, w+1)
    a1 = jnp.dot(cmax, sc1_ref[...], preferred_element_type=f32)     # even cols  (12, 72)

    # ---- conv2 (6->16, k5, VALID) + bias + ReLU -> z2 (8, 8*16) [h, w*16+o] ----
    acc2 = jnp.dot(a1[0:8, :], c2m_ref[0], preferred_element_type=f32)
    for i in range(1, 5):
        acc2 = acc2 + jnp.dot(a1[i:i + 8, :], c2m_ref[i],
                              preferred_element_type=f32)
    z2 = jnp.maximum(acc2 + c2b_ref[...], 0.0)                       # (8, 128)

    # ---- pool2 2x2/2 -> a2 (4, 4*16) ----
    rmax2 = jnp.maximum(z2[0:7, :], z2[1:8, :])
    ph2 = jnp.dot(sr2_ref[...], rmax2, preferred_element_type=f32)   # (4, 128)
    cmax2 = jnp.maximum(ph2[:, 0:112], ph2[:, 16:128])
    a2 = jnp.dot(cmax2, sc2_ref[...], preferred_element_type=f32)    # (4, 64)

    # ---- fc1 (256->120) + ReLU; NCHW flatten folded into f1w_ref ----
    y = f1b_ref[...]                                                 # (1, 120)
    for h in range(4):
        y = y + jnp.dot(a2[h:h + 1, :], f1w_ref[h],
                        preferred_element_type=f32)
    y = jnp.maximum(y, 0.0)

    # ---- fc2 (120->84) + ReLU ----
    y = jnp.maximum(jnp.dot(y, f2w_ref[...], preferred_element_type=f32)
                    + f2b_ref[...], 0.0)

    # ---- fc3 (84->10) + ReLU (the reference model applies ReLU after fc3) ----
    y = jnp.maximum(jnp.dot(y, f3w_ref[...], preferred_element_type=f32)
                    + f3b_ref[...], 0.0)

    out_ref[0] = y                                                   # (1, 10)


def _full_spec(shape):
    nd = len(shape)
    return pl.BlockSpec(shape, lambda n, _nd=nd: (0,) * _nd)


@jax.jit
def model_mnist_forward(packed, x_nchw):
    """x_nchw: (N, 1, 28, 28) float32 -> logits (N, 10) float32."""
    n, c, h, w = x_nchw.shape
    assert (c, h, w) == (1, 28, 28)
    x3 = x_nchw.reshape(n, 28, 28)

    in_specs = [pl.BlockSpec((1, 28, 28), lambda i: (i, 0, 0))]
    in_specs += [_full_spec(p.shape) for p in packed]

    out = pl.pallas_call(
        _lenet_kernel,
        out_shape=jax.ShapeDtypeStruct((n, 1, 10), jnp.float32),
        grid=(n,),
        in_specs=in_specs,
        out_specs=pl.BlockSpec((1, 1, 10), lambda i: (i, 0, 0)),
        compiler_params=pltpu.CompilerParams(
            dimension_semantics=("parallel",)),
    )(x3, *packed)
    return out.reshape(n, 10)


# --------------------------------------------------------------------------
# Parameters: raw PyTorch-layout weights + one-time repacking to kernel form.
# --------------------------------------------------------------------------
def make_raw_params(key):
    ks = jax.random.split(key, 10)

    def u(k, shape, fan_in):
        b = 1.0 / (fan_in ** 0.5)
        return jax.random.uniform(k, shape, jnp.float32, -b, b)

    return {
        "conv1_w": u(ks[0], (6, 1, 5, 5), 25),   "conv1_b": u(ks[1], (6,), 25),
        "conv2_w": u(ks[2], (16, 6, 5, 5), 150), "conv2_b": u(ks[3], (16,), 150),
        "fc1_w": u(ks[4], (120, 256), 256),      "fc1_b": u(ks[5], (120,), 256),
        "fc2_w": u(ks[6], (84, 120), 120),       "fc2_b": u(ks[7], (84,), 120),
        "fc3_w": u(ks[8], (10, 84), 84),         "fc3_b": u(ks[9], (10,), 84),
    }


def pack_params(raw):
    """One-time host-side repack: convs -> banded per-row matmul weights,
    pool stride-2 compaction -> constant 0/1 selection matrices,
    fc1 -> NCHW-flatten permutation folded into its weight."""
    w1 = np.asarray(raw["conv1_w"]); b1 = np.asarray(raw["conv1_b"])
    w2 = np.asarray(raw["conv2_w"]); b2 = np.asarray(raw["conv2_b"])
    f1w = np.asarray(raw["fc1_w"]);  f1b = np.asarray(raw["fc1_b"])
    f2w = np.asarray(raw["fc2_w"]);  f2b = np.asarray(raw["fc2_b"])
    f3w = np.asarray(raw["fc3_w"]);  f3b = np.asarray(raw["fc3_b"])

    # conv1: B1[i, w+j, w*6+o] = w1[o, 0, i, j]
    B1 = np.zeros((5, 28, 24, 6), np.float32)
    for i in range(5):
        for j in range(5):
            for w in range(24):
                B1[i, w + j, w, :] = w1[:, 0, i, j]
    B1 = B1.reshape(5, 28, 144)
    b1r = np.tile(b1, 24).reshape(1, 144).astype(np.float32)

    # conv2: B2[i, (w+j)*6+cin, w*16+o] = w2[o, cin, i, j]
    B2 = np.zeros((5, 12, 6, 8, 16), np.float32)
    for i in range(5):
        for j in range(5):
            for w in range(8):
                B2[i, w + j, :, w, :] = w2[:, :, i, j].T
    B2 = B2.reshape(5, 72, 128)
    b2r = np.tile(b2, 8).reshape(1, 128).astype(np.float32)

    # pool1 stride-2 selection (rows 0,2,..,22 ; even-w channel groups of 6)
    Sr1 = np.zeros((12, 23), np.float32)
    Sr1[np.arange(12), 2 * np.arange(12)] = 1.0
    Sc1 = np.zeros((138, 72), np.float32)
    for b in range(12):
        for c in range(6):
            Sc1[12 * b + c, 6 * b + c] = 1.0

    # pool2 stride-2 selection (rows 0,2,4,6 ; even-w channel groups of 16)
    Sr2 = np.zeros((4, 7), np.float32)
    Sr2[np.arange(4), 2 * np.arange(4)] = 1.0
    Sc2 = np.zeros((112, 64), np.float32)
    for b in range(4):
        for o in range(16):
            Sc2[32 * b + o, 16 * b + o] = 1.0

    # fc1 with the PyTorch NCHW flatten folded in:
    # Wf1[h, w*16+o, m] = f1w[m, o*16 + h*4 + w]
    Wf1 = (f1w.reshape(120, 16, 4, 4).transpose(2, 3, 1, 0)
              .reshape(4, 64, 120).astype(np.float32))
    Wf2 = f2w.T.astype(np.float32)     # (120, 84)
    Wf3 = f3w.T.astype(np.float32)     # (84, 10)

    packed = (B1, b1r, B2, b2r, Sr1, Sc1, Sr2, Sc2,
              Wf1, f1b.reshape(1, 120).astype(np.float32),
              Wf2, f2b.reshape(1, 84).astype(np.float32),
              Wf3, f3b.reshape(1, 10).astype(np.float32))
    return tuple(jnp.asarray(a) for a in packed)


# --------------------------------------------------------------------------
# Pure-JAX reference (for a correctness check of the fused kernel).
# --------------------------------------------------------------------------
def _pool2x2(y):
    n, c, h, w = y.shape
    return y.reshape(n, c, h // 2, 2, w // 2, 2).max(axis=(3, 5))


def _reference_forward(raw, x_nchw):
    hp = jax.lax.Precision.HIGHEST
    y = jax.lax.conv_general_dilated(
        x_nchw, raw["conv1_w"], window_strides=(1, 1), padding="VALID",
        dimension_numbers=("NCHW", "OIHW", "NCHW"), precision=hp)
    y = jnp.maximum(y + raw["conv1_b"][None, :, None, None], 0.0)
    y = _pool2x2(y)
    y = jax.lax.conv_general_dilated(
        y, raw["conv2_w"], window_strides=(1, 1), padding="VALID",
        dimension_numbers=("NCHW", "OIHW", "NCHW"), precision=hp)
    y = jnp.maximum(y + raw["conv2_b"][None, :, None, None], 0.0)
    y = _pool2x2(y)
    y = y.reshape(y.shape[0], -1)
    y = jnp.maximum(jnp.dot(y, raw["fc1_w"].T, precision=hp) + raw["fc1_b"], 0.0)
    y = jnp.maximum(jnp.dot(y, raw["fc2_w"].T, precision=hp) + raw["fc2_b"], 0.0)
    y = jnp.maximum(jnp.dot(y, raw["fc3_w"].T, precision=hp) + raw["fc3_b"], 0.0)
    return y


# --------------------------------------------------------------------------

if __name__ == "__main__":
    key = jax.random.PRNGKey(0)
    k_param, k_input = jax.random.split(key)

    raw = make_raw_params(k_param)
    packed = pack_params(raw)

    # MNIST-shaped input: batch=2, 1 channel, 28x28 (NCHW like PyTorch).
    x = jax.random.normal(k_input, (2, 1, 28, 28), jnp.float32)

    logits = model_mnist_forward(packed, x)
    logits = jax.block_until_ready(logits)
    assert logits.shape == (2, 10) and logits.dtype == jnp.float32

    ref = jax.block_until_ready(_reference_forward(raw, x))
    np.testing.assert_allclose(np.asarray(logits), np.asarray(ref),
                               rtol=1e-2, atol=1e-2)
    print("KERNEL_OK")
</pallas_src>

<mosaic_0001>
module attributes {stable_mosaic.version = 11 : i64} {
  func.func @_lenet_kernel(%arg0: i32, %arg1: memref<1x28x28xf32, #tpu.memory_space<vmem>>, %arg2: memref<5x28x144xf32, #tpu.memory_space<vmem>>, %arg3: memref<1x144xf32, #tpu.memory_space<vmem>>, %arg4: memref<5x72x128xf32, #tpu.memory_space<vmem>>, %arg5: memref<1x128xf32, #tpu.memory_space<vmem>>, %arg6: memref<12x23xf32, #tpu.memory_space<vmem>>, %arg7: memref<138x72xf32, #tpu.memory_space<vmem>>, %arg8: memref<4x7xf32, #tpu.memory_space<vmem>>, %arg9: memref<112x64xf32, #tpu.memory_space<vmem>>, %arg10: memref<4x64x120xf32, #tpu.memory_space<vmem>>, %arg11: memref<1x120xf32, #tpu.memory_space<vmem>>, %arg12: memref<120x84xf32, #tpu.memory_space<vmem>>, %arg13: memref<1x84xf32, #tpu.memory_space<vmem>>, %arg14: memref<84x10xf32, #tpu.memory_space<vmem>>, %arg15: memref<1x10xf32, #tpu.memory_space<vmem>>, %arg16: memref<1x1x10xf32, #tpu.memory_space<vmem>>) attributes {dimension_semantics = [#tpu.dimension_semantics<parallel>], iteration_bounds = array<i64: 2>, scalar_prefetch = 0 : i64, scratch_operands = 0 : i64, tpu.core_type = #tpu.core_type<tc>, window_params = [{transform_indices = @transform_0, window_bounds = array<i64: 1, 28, 28>}, {pipeline_mode = #tpu.pipeline_mode<synchronous>, transform_indices = @transform_1, window_bounds = array<i64: 5, 28, 144>}, {pipeline_mode = #tpu.pipeline_mode<synchronous>, transform_indices = @transform_2, window_bounds = array<i64: 1, 144>}, {pipeline_mode = #tpu.pipeline_mode<synchronous>, transform_indices = @transform_3, window_bounds = array<i64: 5, 72, 128>}, {pipeline_mode = #tpu.pipeline_mode<synchronous>, transform_indices = @transform_4, window_bounds = array<i64: 1, 128>}, {pipeline_mode = #tpu.pipeline_mode<synchronous>, transform_indices = @transform_5, window_bounds = array<i64: 12, 23>}, {pipeline_mode = #tpu.pipeline_mode<synchronous>, transform_indices = @transform_6, window_bounds = array<i64: 138, 72>}, {pipeline_mode = #tpu.pipeline_mode<synchronous>, transform_indices = @transform_7, window_bounds = array<i64: 4, 7>}, {pipeline_mode = #tpu.pipeline_mode<synchronous>, transform_indices = @transform_8, window_bounds = array<i64: 112, 64>}, {pipeline_mode = #tpu.pipeline_mode<synchronous>, transform_indices = @transform_9, window_bounds = array<i64: 4, 64, 120>}, {pipeline_mode = #tpu.pipeline_mode<synchronous>, transform_indices = @transform_10, window_bounds = array<i64: 1, 120>}, {pipeline_mode = #tpu.pipeline_mode<synchronous>, transform_indices = @transform_11, window_bounds = array<i64: 120, 84>}, {pipeline_mode = #tpu.pipeline_mode<synchronous>, transform_indices = @transform_12, window_bounds = array<i64: 1, 84>}, {pipeline_mode = #tpu.pipeline_mode<synchronous>, transform_indices = @transform_13, window_bounds = array<i64: 84, 10>}, {pipeline_mode = #tpu.pipeline_mode<synchronous>, transform_indices = @transform_14, window_bounds = array<i64: 1, 10>}, {transform_indices = @transform_15, window_bounds = array<i64: 1, 1, 10>}]} {
    %c0 = arith.constant 0 : index
    %c0_0 = arith.constant 0 : index
    %c0_1 = arith.constant 0 : index
    %0 = vector.load %arg1[%c0, %c0_0, %c0_1] : memref<1x28x28xf32, #tpu.memory_space<vmem>>, vector<1x28x28xf32>
    %1 = vector.shape_cast %0 : vector<1x28x28xf32> to vector<28x28xf32>
    %2 = vector.extract_strided_slice %1 {offsets = [0, 0], sizes = [24, 28], strides = [1, 1]} : vector<28x28xf32> to vector<24x28xf32>
    %c0_2 = arith.constant 0 : index
    %c0_3 = arith.constant 0 : index
    %c0_4 = arith.constant 0 : index
    %3 = vector.load %arg2[%c0_2, %c0_3, %c0_4] : memref<5x28x144xf32, #tpu.memory_space<vmem>>, vector<1x28x144xf32>
    %4 = vector.shape_cast %3 : vector<1x28x144xf32> to vector<28x144xf32>
    %cst = arith.constant dense<0.000000e+00> : vector<24x144xf32>
    %5 = tpu.matmul %2, %4, %cst {dimension_numbers = #tpu.dot_dimension_numbers<[1], [0], [0], [1], [0, 0, 1, 1], [], []>} : vector<24x28xf32>, vector<28x144xf32>, vector<24x144xf32> -> vector<24x144xf32>
    %6 = vector.extract_strided_slice %1 {offsets = [1, 0], sizes = [24, 28], strides = [1, 1]} : vector<28x28xf32> to vector<24x28xf32>
    %c1 = arith.constant 1 : index
    %c0_5 = arith.constant 0 : index
    %c0_6 = arith.constant 0 : index
    %7 = vector.load %arg2[%c1, %c0_5, %c0_6] : memref<5x28x144xf32, #tpu.memory_space<vmem>>, vector<1x28x144xf32>
    %8 = vector.shape_cast %7 : vector<1x28x144xf32> to vector<28x144xf32>
    %cst_7 = arith.constant dense<0.000000e+00> : vector<24x144xf32>
    %9 = tpu.matmul %6, %8, %cst_7 {dimension_numbers = #tpu.dot_dimension_numbers<[1], [0], [0], [1], [0, 0, 1, 1], [], []>} : vector<24x28xf32>, vector<28x144xf32>, vector<24x144xf32> -> vector<24x144xf32>
    %10 = arith.addf %5, %9 : vector<24x144xf32>
    %11 = vector.extract_strided_slice %1 {offsets = [2, 0], sizes = [24, 28], strides = [1, 1]} : vector<28x28xf32> to vector<24x28xf32>
    %c2 = arith.constant 2 : index
    %c0_8 = arith.constant 0 : index
    %c0_9 = arith.constant 0 : index
    %12 = vector.load %arg2[%c2, %c0_8, %c0_9] : memref<5x28x144xf32, #tpu.memory_space<vmem>>, vector<1x28x144xf32>
    %13 = vector.shape_cast %12 : vector<1x28x144xf32> to vector<28x144xf32>
    %cst_10 = arith.constant dense<0.000000e+00> : vector<24x144xf32>
    %14 = tpu.matmul %11, %13, %cst_10 {dimension_numbers = #tpu.dot_dimension_numbers<[1], [0], [0], [1], [0, 0, 1, 1], [], []>} : vector<24x28xf32>, vector<28x144xf32>, vector<24x144xf32> -> vector<24x144xf32>
    %15 = arith.addf %10, %14 : vector<24x144xf32>
    %16 = vector.extract_strided_slice %1 {offsets = [3, 0], sizes = [24, 28], strides = [1, 1]} : vector<28x28xf32> to vector<24x28xf32>
    %c3 = arith.constant 3 : index
    %c0_11 = arith.constant 0 : index
    %c0_12 = arith.constant 0 : index
    %17 = vector.load %arg2[%c3, %c0_11, %c0_12] : memref<5x28x144xf32, #tpu.memory_space<vmem>>, vector<1x28x144xf32>
    %18 = vector.shape_cast %17 : vector<1x28x144xf32> to vector<28x144xf32>
    %cst_13 = arith.constant dense<0.000000e+00> : vector<24x144xf32>
    %19 = tpu.matmul %16, %18, %cst_13 {dimension_numbers = #tpu.dot_dimension_numbers<[1], [0], [0], [1], [0, 0, 1, 1], [], []>} : vector<24x28xf32>, vector<28x144xf32>, vector<24x144xf32> -> vector<24x144xf32>
    %20 = arith.addf %15, %19 : vector<24x144xf32>
    %21 = vector.extract_strided_slice %1 {offsets = [4, 0], sizes = [24, 28], strides = [1, 1]} : vector<28x28xf32> to vector<24x28xf32>
    %c4 = arith.constant 4 : index
    %c0_14 = arith.constant 0 : index
    %c0_15 = arith.constant 0 : index
    %22 = vector.load %arg2[%c4, %c0_14, %c0_15] : memref<5x28x144xf32, #tpu.memory_space<vmem>>, vector<1x28x144xf32>
    %23 = vector.shape_cast %22 : vector<1x28x144xf32> to vector<28x144xf32>
    %cst_16 = arith.constant dense<0.000000e+00> : vector<24x144xf32>
    %24 = tpu.matmul %21, %23, %cst_16 {dimension_numbers = #tpu.dot_dimension_numbers<[1], [0], [0], [1], [0, 0, 1, 1], [], []>} : vector<24x28xf32>, vector<28x144xf32>, vector<24x144xf32> -> vector<24x144xf32>
    %25 = arith.addf %20, %24 : vector<24x144xf32>
    %c0_17 = arith.constant 0 : index
    %c0_18 = arith.constant 0 : index
    %26 = vector.load %arg3[%c0_17, %c0_18] : memref<1x144xf32, #tpu.memory_space<vmem>>, vector<1x144xf32>
    %27 = vector.broadcast %26 : vector<1x144xf32> to vector<24x144xf32>
    %28 = arith.addf %25, %27 : vector<24x144xf32>
    %cst_19 = arith.constant 0.000000e+00 : f32
    %29 = vector.broadcast %cst_19 : f32 to vector<24x144xf32>
    %30 = arith.maximumf %28, %29 : vector<24x144xf32>
    %31 = vector.extract_strided_slice %30 {offsets = [0, 0], sizes = [23, 144], strides = [1, 1]} : vector<24x144xf32> to vector<23x144xf32>
    %32 = vector.extract_strided_slice %30 {offsets = [1, 0], sizes = [23, 144], strides = [1, 1]} : vector<24x144xf32> to vector<23x144xf32>
    %33 = arith.maximumf %31, %32 : vector<23x144xf32>
    %c0_20 = arith.constant 0 : index
    %c0_21 = arith.constant 0 : index
    %34 = vector.load %arg6[%c0_20, %c0_21] : memref<12x23xf32, #tpu.memory_space<vmem>>, vector<12x23xf32>
    %cst_22 = arith.constant dense<0.000000e+00> : vector<12x144xf32>
    %35 = tpu.matmul %34, %33, %cst_22 {dimension_numbers = #tpu.dot_dimension_numbers<[1], [0], [0], [1], [0, 0, 1, 1], [], []>} : vector<12x23xf32>, vector<23x144xf32>, vector<12x144xf32> -> vector<12x144xf32>
    %36 = vector.extract_strided_slice %35 {offsets = [0, 0], sizes = [12, 138], strides = [1, 1]} : vector<12x144xf32> to vector<12x138xf32>
    %37 = vector.extract_strided_slice %35 {offsets = [0, 6], sizes = [12, 138], strides = [1, 1]} : vector<12x144xf32> to vector<12x138xf32>
    %38 = arith.maximumf %36, %37 : vector<12x138xf32>
    %c0_23 = arith.constant 0 : index
    %c0_24 = arith.constant 0 : index
    %39 = vector.load %arg7[%c0_23, %c0_24] : memref<138x72xf32, #tpu.memory_space<vmem>>, vector<138x72xf32>
    %cst_25 = arith.constant dense<0.000000e+00> : vector<12x72xf32>
    %40 = tpu.matmul %38, %39, %cst_25 {dimension_numbers = #tpu.dot_dimension_numbers<[1], [0], [0], [1], [0, 0, 1, 1], [], []>} : vector<12x138xf32>, vector<138x72xf32>, vector<12x72xf32> -> vector<12x72xf32>
    %41 = vector.extract_strided_slice %40 {offsets = [0, 0], sizes = [8, 72], strides = [1, 1]} : vector<12x72xf32> to vector<8x72xf32>
    %c0_26 = arith.constant 0 : index
    %c0_27 = arith.constant 0 : index
    %c0_28 = arith.constant 0 : index
    %42 = vector.load %arg4[%c0_26, %c0_27, %c0_28] : memref<5x72x128xf32, #tpu.memory_space<vmem>>, vector<1x72x128xf32>
    %43 = vector.shape_cast %42 : vector<1x72x128xf32> to vector<72x128xf32>
    %cst_29 = arith.constant dense<0.000000e+00> : vector<8x128xf32>
    %44 = tpu.matmul %41, %43, %cst_29 {dimension_numbers = #tpu.dot_dimension_numbers<[1], [0], [0], [1], [0, 0, 1, 1], [], []>} : vector<8x72xf32>, vector<72x128xf32>, vector<8x128xf32> -> vector<8x128xf32>
    %45 = vector.extract_strided_slice %40 {offsets = [1, 0], sizes = [8, 72], strides = [1, 1]} : vector<12x72xf32> to vector<8x72xf32>
    %c1_30 = arith.constant 1 : index
    %c0_31 = arith.constant 0 : index
    %c0_32 = arith.constant 0 : index
    %46 = vector.load %arg4[%c1_30, %c0_31, %c0_32] : memref<5x72x128xf32, #tpu.memory_space<vmem>>, vector<1x72x128xf32>
    %47 = vector.shape_cast %46 : vector<1x72x128xf32> to vector<72x128xf32>
    %cst_33 = arith.constant dense<0.000000e+00> : vector<8x128xf32>
    %48 = tpu.matmul %45, %47, %cst_33 {dimension_numbers = #tpu.dot_dimension_numbers<[1], [0], [0], [1], [0, 0, 1, 1], [], []>} : vector<8x72xf32>, vector<72x128xf32>, vector<8x128xf32> -> vector<8x128xf32>
    %49 = arith.addf %44, %48 : vector<8x128xf32>
    %50 = vector.extract_strided_slice %40 {offsets = [2, 0], sizes = [8, 72], strides = [1, 1]} : vector<12x72xf32> to vector<8x72xf32>
    %c2_34 = arith.constant 2 : index
    %c0_35 = arith.constant 0 : index
    %c0_36 = arith.constant 0 : index
    %51 = vector.load %arg4[%c2_34, %c0_35, %c0_36] : memref<5x72x128xf32, #tpu.memory_space<vmem>>, vector<1x72x128xf32>
    %52 = vector.shape_cast %51 : vector<1x72x128xf32> to vector<72x128xf32>
    %cst_37 = arith.constant dense<0.000000e+00> : vector<8x128xf32>
    %53 = tpu.matmul %50, %52, %cst_37 {dimension_numbers = #tpu.dot_dimension_numbers<[1], [0], [0], [1], [0, 0, 1, 1], [], []>} : vector<8x72xf32>, vector<72x128xf32>, vector<8x128xf32> -> vector<8x128xf32>
    %54 = arith.addf %49, %53 : vector<8x128xf32>
    %55 = vector.extract_strided_slice %40 {offsets = [3, 0], sizes = [8, 72], strides = [1, 1]} : vector<12x72xf32> to vector<8x72xf32>
    %c3_38 = arith.constant 3 : index
    %c0_39 = arith.constant 0 : index
    %c0_40 = arith.constant 0 : index
    %56 = vector.load %arg4[%c3_38, %c0_39, %c0_40] : memref<5x72x128xf32, #tpu.memory_space<vmem>>, vector<1x72x128xf32>
    %57 = vector.shape_cast %56 : vector<1x72x128xf32> to vector<72x128xf32>
    %cst_41 = arith.constant dense<0.000000e+00> : vector<8x128xf32>
    %58 = tpu.matmul %55, %57, %cst_41 {dimension_numbers = #tpu.dot_dimension_numbers<[1], [0], [0], [1], [0, 0, 1, 1], [], []>} : vector<8x72xf32>, vector<72x128xf32>, vector<8x128xf32> -> vector<8x128xf32>
    %59 = arith.addf %54, %58 : vector<8x128xf32>
    %60 = vector.extract_strided_slice %40 {offsets = [4, 0], sizes = [8, 72], strides = [1, 1]} : vector<12x72xf32> to vector<8x72xf32>
    %c4_42 = arith.constant 4 : index
    %c0_43 = arith.constant 0 : index
    %c0_44 = arith.constant 0 : index
    %61 = vector.load %arg4[%c4_42, %c0_43, %c0_44] : memref<5x72x128xf32, #tpu.memory_space<vmem>>, vector<1x72x128xf32>
    %62 = vector.shape_cast %61 : vector<1x72x128xf32> to vector<72x128xf32>
    %cst_45 = arith.constant dense<0.000000e+00> : vector<8x128xf32>
    %63 = tpu.matmul %60, %62, %cst_45 {dimension_numbers = #tpu.dot_dimension_numbers<[1], [0], [0], [1], [0, 0, 1, 1], [], []>} : vector<8x72xf32>, vector<72x128xf32>, vector<8x128xf32> -> vector<8x128xf32>
    %64 = arith.addf %59, %63 : vector<8x128xf32>
    %c0_46 = arith.constant 0 : index
    %c0_47 = arith.constant 0 : index
    %65 = vector.load %arg5[%c0_46, %c0_47] : memref<1x128xf32, #tpu.memory_space<vmem>>, vector<1x128xf32>
    %66 = vector.broadcast %65 : vector<1x128xf32> to vector<8x128xf32>
    %67 = arith.addf %64, %66 : vector<8x128xf32>
    %cst_48 = arith.constant 0.000000e+00 : f32
    %68 = vector.broadcast %cst_48 : f32 to vector<8x128xf32>
    %69 = arith.maximumf %67, %68 : vector<8x128xf32>
    %70 = vector.extract_strided_slice %69 {offsets = [0, 0], sizes = [7, 128], strides = [1, 1]} : vector<8x128xf32> to vector<7x128xf32>
    %71 = vector.extract_strided_slice %69 {offsets = [1, 0], sizes = [7, 128], strides = [1, 1]} : vector<8x128xf32> to vector<7x128xf32>
    %72 = arith.maximumf %70, %71 : vector<7x128xf32>
    %c0_49 = arith.constant 0 : index
    %c0_50 = arith.constant 0 : index
    %73 = vector.load %arg8[%c0_49, %c0_50] : memref<4x7xf32, #tpu.memory_space<vmem>>, vector<4x7xf32>
    %cst_51 = arith.constant dense<0.000000e+00> : vector<4x128xf32>
    %74 = tpu.matmul %73, %72, %cst_51 {dimension_numbers = #tpu.dot_dimension_numbers<[1], [0], [0], [1], [0, 0, 1, 1], [], []>} : vector<4x7xf32>, vector<7x128xf32>, vector<4x128xf32> -> vector<4x128xf32>
    %75 = vector.extract_strided_slice %74 {offsets = [0, 0], sizes = [4, 112], strides = [1, 1]} : vector<4x128xf32> to vector<4x112xf32>
    %76 = vector.extract_strided_slice %74 {offsets = [0, 16], sizes = [4, 112], strides = [1, 1]} : vector<4x128xf32> to vector<4x112xf32>
    %77 = arith.maximumf %75, %76 : vector<4x112xf32>
    %c0_52 = arith.constant 0 : index
    %c0_53 = arith.constant 0 : index
    %78 = vector.load %arg9[%c0_52, %c0_53] : memref<112x64xf32, #tpu.memory_space<vmem>>, vector<112x64xf32>
    %cst_54 = arith.constant dense<0.000000e+00> : vector<4x64xf32>
    %79 = tpu.matmul %77, %78, %cst_54 {dimension_numbers = #tpu.dot_dimension_numbers<[1], [0], [0], [1], [0, 0, 1, 1], [], []>} : vector<4x112xf32>, vector<112x64xf32>, vector<4x64xf32> -> vector<4x64xf32>
    %c0_55 = arith.constant 0 : index
    %c0_56 = arith.constant 0 : index
    %80 = vector.load %arg11[%c0_55, %c0_56] : memref<1x120xf32, #tpu.memory_space<vmem>>, vector<1x120xf32>
    %81 = vector.extract_strided_slice %79 {offsets = [0, 0], sizes = [1, 64], strides = [1, 1]} : vector<4x64xf32> to vector<1x64xf32>
    %c0_57 = arith.constant 0 : index
    %c0_58 = arith.constant 0 : index
    %c0_59 = arith.constant 0 : index
    %82 = vector.load %arg10[%c0_57, %c0_58, %c0_59] : memref<4x64x120xf32, #tpu.memory_space<vmem>>, vector<1x64x120xf32>
    %83 = vector.shape_cast %82 : vector<1x64x120xf32> to vector<64x120xf32>
    %cst_60 = arith.constant dense<0.000000e+00> : vector<1x120xf32>
    %84 = tpu.matmul %81, %83, %cst_60 {dimension_numbers = #tpu.dot_dimension_numbers<[1], [0], [0], [1], [0, 0, 1, 1], [], []>} : vector<1x64xf32>, vector<64x120xf32>, vector<1x120xf32> -> vector<1x120xf32>
    %85 = arith.addf %80, %84 : vector<1x120xf32>
    %86 = vector.extract_strided_slice %79 {offsets = [1, 0], sizes = [1, 64], strides = [1, 1]} : vector<4x64xf32> to vector<1x64xf32>
    %c1_61 = arith.constant 1 : index
    %c0_62 = arith.constant 0 : index
    %c0_63 = arith.constant 0 : index
    %87 = vector.load %arg10[%c1_61, %c0_62, %c0_63] : memref<4x64x120xf32, #tpu.memory_space<vmem>>, vector<1x64x120xf32>
    %88 = vector.shape_cast %87 : vector<1x64x120xf32> to vector<64x120xf32>
    %cst_64 = arith.constant dense<0.000000e+00> : vector<1x120xf32>
    %89 = tpu.matmul %86, %88, %cst_64 {dimension_numbers = #tpu.dot_dimension_numbers<[1], [0], [0], [1], [0, 0, 1, 1], [], []>} : vector<1x64xf32>, vector<64x120xf32>, vector<1x120xf32> -> vector<1x120xf32>
    %90 = arith.addf %85, %89 : vector<1x120xf32>
    %91 = vector.extract_strided_slice %79 {offsets = [2, 0], sizes = [1, 64], strides = [1, 1]} : vector<4x64xf32> to vector<1x64xf32>
    %c2_65 = arith.constant 2 : index
    %c0_66 = arith.constant 0 : index
    %c0_67 = arith.constant 0 : index
    %92 = vector.load %arg10[%c2_65, %c0_66, %c0_67] : memref<4x64x120xf32, #tpu.memory_space<vmem>>, vector<1x64x120xf32>
    %93 = vector.shape_cast %92 : vector<1x64x120xf32> to vector<64x120xf32>
    %cst_68 = arith.constant dense<0.000000e+00> : vector<1x120xf32>
    %94 = tpu.matmul %91, %93, %cst_68 {dimension_numbers = #tpu.dot_dimension_numbers<[1], [0], [0], [1], [0, 0, 1, 1], [], []>} : vector<1x64xf32>, vector<64x120xf32>, vector<1x120xf32> -> vector<1x120xf32>
    %95 = arith.addf %90, %94 : vector<1x120xf32>
    %96 = vector.extract_strided_slice %79 {offsets = [3, 0], sizes = [1, 64], strides = [1, 1]} : vector<4x64xf32> to vector<1x64xf32>
    %c3_69 = arith.constant 3 : index
    %c0_70 = arith.constant 0 : index
    %c0_71 = arith.constant 0 : index
    %97 = vector.load %arg10[%c3_69, %c0_70, %c0_71] : memref<4x64x120xf32, #tpu.memory_space<vmem>>, vector<1x64x120xf32>
    %98 = vector.shape_cast %97 : vector<1x64x120xf32> to vector<64x120xf32>
    %cst_72 = arith.constant dense<0.000000e+00> : vector<1x120xf32>
    %99 = tpu.matmul %96, %98, %cst_72 {dimension_numbers = #tpu.dot_dimension_numbers<[1], [0], [0], [1], [0, 0, 1, 1], [], []>} : vector<1x64xf32>, vector<64x120xf32>, vector<1x120xf32> -> vector<1x120xf32>
    %100 = arith.addf %95, %99 : vector<1x120xf32>
    %cst_73 = arith.constant 0.000000e+00 : f32
    %101 = vector.broadcast %cst_73 : f32 to vector<1x120xf32>
    %102 = arith.maximumf %100, %101 : vector<1x120xf32>
    %c0_74 = arith.constant 0 : index
    %c0_75 = arith.constant 0 : index
    %103 = vector.load %arg12[%c0_74, %c0_75] : memref<120x84xf32, #tpu.memory_space<vmem>>, vector<120x84xf32>
    %cst_76 = arith.constant dense<0.000000e+00> : vector<1x84xf32>
    %104 = tpu.matmul %102, %103, %cst_76 {dimension_numbers = #tpu.dot_dimension_numbers<[1], [0], [0], [1], [0, 0, 1, 1], [], []>} : vector<1x120xf32>, vector<120x84xf32>, vector<1x84xf32> -> vector<1x84xf32>
    %c0_77 = arith.constant 0 : index
    %c0_78 = arith.constant 0 : index
    %105 = vector.load %arg13[%c0_77, %c0_78] : memref<1x84xf32, #tpu.memory_space<vmem>>, vector<1x84xf32>
    %106 = arith.addf %104, %105 : vector<1x84xf32>
    %cst_79 = arith.constant 0.000000e+00 : f32
    %107 = vector.broadcast %cst_79 : f32 to vector<1x84xf32>
    %108 = arith.maximumf %106, %107 : vector<1x84xf32>
    %c0_80 = arith.constant 0 : index
    %c0_81 = arith.constant 0 : index
    %109 = vector.load %arg14[%c0_80, %c0_81] : memref<84x10xf32, #tpu.memory_space<vmem>>, vector<84x10xf32>
    %cst_82 = arith.constant dense<0.000000e+00> : vector<1x10xf32>
    %110 = tpu.matmul %108, %109, %cst_82 {dimension_numbers = #tpu.dot_dimension_numbers<[1], [0], [0], [1], [0, 0, 1, 1], [], []>} : vector<1x84xf32>, vector<84x10xf32>, vector<1x10xf32> -> vector<1x10xf32>
    %c0_83 = arith.constant 0 : index
    %c0_84 = arith.constant 0 : index
    %111 = vector.load %arg15[%c0_83, %c0_84] : memref<1x10xf32, #tpu.memory_space<vmem>>, vector<1x10xf32>
    %112 = arith.addf %110, %111 : vector<1x10xf32>
    %cst_85 = arith.constant 0.000000e+00 : f32
    %113 = vector.broadcast %cst_85 : f32 to vector<1x10xf32>
    %114 = arith.maximumf %112, %113 : vector<1x10xf32>
    %c0_86 = arith.constant 0 : index
    %c0_87 = arith.constant 0 : index
    %c0_88 = arith.constant 0 : index
    %115 = vector.load %arg16[%c0_86, %c0_87, %c0_88] : memref<1x1x10xf32, #tpu.memory_space<vmem>>, vector<1x1x10xf32>
    %116 = vector.shape_cast %115 : vector<1x1x10xf32> to vector<1x10xf32>
    %117 = vector.shape_cast %114 : vector<1x10xf32> to vector<1x1x10xf32>
    tpu.vector_store %arg16[%c0_86, %c0_87, %c0_88], %117 {strides = array<i32>} : memref<1x1x10xf32, #tpu.memory_space<vmem>>, vector<1x1x10xf32>,
    return
  }
  func.func @transform_0(%arg0: i32) -> (i32, i32, i32) {
    %c0_i32 = arith.constant 0 : i32
    %c0_i32_0 = arith.constant 0 : i32
    %c0_i32_1 = arith.constant 0 : i32
    return %arg0, %c0_i32, %c0_i32_0 : i32, i32, i32
  }
  func.func @transform_1(%arg0: i32) -> (i32, i32, i32) {
    %c0_i32 = arith.constant 0 : i32
    %c0_i32_0 = arith.constant 0 : i32
    %c0_i32_1 = arith.constant 0 : i32
    %c0_i32_2 = arith.constant 0 : i32
    return %c0_i32, %c0_i32_0, %c0_i32_1 : i32, i32, i32
  }
  func.func @transform_2(%arg0: i32) -> (i32, i32) {
    %c0_i32 = arith.constant 0 : i32
    %c0_i32_0 = arith.constant 0 : i32
    %c0_i32_1 = arith.constant 0 : i32
    return %c0_i32, %c0_i32_0 : i32, i32
  }
  func.func @transform_3(%arg0: i32) -> (i32, i32, i32) {
    %c0_i32 = arith.constant 0 : i32
    %c0_i32_0 = arith.constant 0 : i32
    %c0_i32_1 = arith.constant 0 : i32
    %c0_i32_2 = arith.constant 0 : i32
    return %c0_i32, %c0_i32_0, %c0_i32_1 : i32, i32, i32
  }
  func.func @transform_4(%arg0: i32) -> (i32, i32) {
    %c0_i32 = arith.constant 0 : i32
    %c0_i32_0 = arith.constant 0 : i32
    %c0_i32_1 = arith.constant 0 : i32
    return %c0_i32, %c0_i32_0 : i32, i32
  }
  func.func @transform_5(%arg0: i32) -> (i32, i32) {
    %c0_i32 = arith.constant 0 : i32
    %c0_i32_0 = arith.constant 0 : i32
    %c0_i32_1 = arith.constant 0 : i32
    return %c0_i32, %c0_i32_0 : i32, i32
  }
  func.func @transform_6(%arg0: i32) -> (i32, i32) {
    %c0_i32 = arith.constant 0 : i32
    %c0_i32_0 = arith.constant 0 : i32
    %c0_i32_1 = arith.constant 0 : i32
    return %c0_i32, %c0_i32_0 : i32, i32
  }
  func.func @transform_7(%arg0: i32) -> (i32, i32) {
    %c0_i32 = arith.constant 0 : i32
    %c0_i32_0 = arith.constant 0 : i32
    %c0_i32_1 = arith.constant 0 : i32
    return %c0_i32, %c0_i32_0 : i32, i32
  }
  func.func @transform_8(%arg0: i32) -> (i32, i32) {
    %c0_i32 = arith.constant 0 : i32
    %c0_i32_0 = arith.constant 0 : i32
    %c0_i32_1 = arith.constant 0 : i32
    return %c0_i32, %c0_i32_0 : i32, i32
  }
  func.func @transform_9(%arg0: i32) -> (i32, i32, i32) {
    %c0_i32 = arith.constant 0 : i32
    %c0_i32_0 = arith.constant 0 : i32
    %c0_i32_1 = arith.constant 0 : i32
    %c0_i32_2 = arith.constant 0 : i32
    return %c0_i32, %c0_i32_0, %c0_i32_1 : i32, i32, i32
  }
  func.func @transform_10(%arg0: i32) -> (i32, i32) {
    %c0_i32 = arith.constant 0 : i32
    %c0_i32_0 = arith.constant 0 : i32
    %c0_i32_1 = arith.constant 0 : i32
    return %c0_i32, %c0_i32_0 : i32, i32
  }
  func.func @transform_11(%arg0: i32) -> (i32, i32) {
    %c0_i32 = arith.constant 0 : i32
    %c0_i32_0 = arith.constant 0 : i32
    %c0_i32_1 = arith.constant 0 : i32
    return %c0_i32, %c0_i32_0 : i32, i32
  }
  func.func @transform_12(%arg0: i32) -> (i32, i32) {
    %c0_i32 = arith.constant 0 : i32
    %c0_i32_0 = arith.constant 0 : i32
    %c0_i32_1 = arith.constant 0 : i32
    return %c0_i32, %c0_i32_0 : i32, i32
  }
  func.func @transform_13(%arg0: i32) -> (i32, i32) {
    %c0_i32 = arith.constant 0 : i32
    %c0_i32_0 = arith.constant 0 : i32
    %c0_i32_1 = arith.constant 0 : i32
    return %c0_i32, %c0_i32_0 : i32, i32
  }
  func.func @transform_14(%arg0: i32) -> (i32, i32) {
    %c0_i32 = arith.constant 0 : i32
    %c0_i32_0 = arith.constant 0 : i32
    %c0_i32_1 = arith.constant 0 : i32
    return %c0_i32, %c0_i32_0 : i32, i32
  }
  func.func @transform_15(%arg0: i32) -> (i32, i32, i32) {
    %c0_i32 = arith.constant 0 : i32
    %c0_i32_0 = arith.constant 0 : i32
    %c0_i32_1 = arith.constant 0 : i32
    return %arg0, %c0_i32, %c0_i32_0 : i32, i32, i32
  }
}

</mosaic_0001>

<bundles_post_ra>
// kernel: model_mnist_forward.1
= control target key start
LH: loop header
LB: loop body
LE: loop exit
PB: predicated region body
PF: predicated region fallthrough
CT: control target
= control target key end

     0   :  { %s4923_s0 = inlined_call_operand.vmem [shape: f32[2,28,28], index: 0, kind: input, shape index: {}]   ;;  %s4924_s1 = inlined_call_operand.vmem [shape: f32[5,28,144], index: 1, kind: input, shape index: {}]   ;;  %s4925_s2 = inlined_call_operand.hbm [shape: f32[1,144], index: 2, kind: input, shape index: {}]   ;;  %s4926_s3 = inlined_call_operand.vmem [shape: f32[5,72,128], index: 3, kind: input, shape index: {}]   ;;  %s4927_s4 = inlined_call_operand.vmem [shape: f32[1,128], index: 4, kind: input, shape index: {}]   ;;  %s4928_s5 = inlined_call_operand.hbm [shape: f32[12,23], index: 5, kind: input, shape index: {}]   ;;  %s4929_s6 = inlined_call_operand.hbm [shape: f32[138,72], index: 6, kind: input, shape index: {}]   ;;  %s4930_s7 = inlined_call_operand.hbm [shape: f32[4,7], index: 7, kind: input, shape index: {}]   ;;  %s4931_s8 = inlined_call_operand.vmem [shape: f32[112,64], index: 8, kind: input, shape index: {}]   ;;  %s4932_s9 = inlined_call_operand.hbm [shape: f32[4,64,120], index: 9, kind: input, shape index: {}]   ;;  %s4933_s10 = inlined_call_operand.hbm [shape: f32[1,120], index: 10, kind: input, shape index: {}]   ;;  %s4934_s11 = inlined_call_operand.vmem [shape: f32[120,84], index: 11, kind: input, shape index: {}]   ;;  %s4935_s12 = inlined_call_operand.hbm [shape: f32[1,84], index: 12, kind: input, shape index: {}]   ;;  %s4936_s13 = inlined_call_operand.vmem [shape: f32[84,10], index: 13, kind: input, shape index: {}]   ;;  %s4937_s14 = inlined_call_operand.vmem [shape: f32[1,10], index: 14, kind: input, shape index: {}]   ;;  %s4938_s15 = inlined_call_operand.hbm [shape: f32[2,1,10], index: 15, kind: output, shape index: {}]  }
   0x1   :  { %4955 = sst [smem:[#allocation28_spill]] %s4925_s2 }
   0x2   :  { %4956 = sst [smem:[#allocation29_spill]] %s4936_s13 }
   0x3   :  { %4957 = sst [smem:[#allocation30_spill]] %s4937_s14 }
   0x4   :  { %4958 = sst [smem:[#allocation31_spill]] %s4938_s15 }
   0x5   :  { %20 = vsyncpa [#allocation3], 0 }
   0x6   :  { %21 = vsyncpa [#allocation6], 0 }
   0x7   :  { %22 = vsyncpa [#allocation9], 0 }
   0x8   :  { %23 = vsyncpa [#allocation12], 0 }
   0x9   :  { %24 = vsyncpa [#allocation4], 0 }
   0xa   :  { %26 = vsyncpa [#allocation4 + $0x1], 0  ;;  %s4018_s18 = smov 0   ;;  %s4020_s19 = smov 0  }
   0xb   :  { %s4022_s20 = smov 0   ;;  %s4024_s21 = smov 0  }
   0xc LB: > { %4959 = sst [smem:[#allocation20_spill]] %s3908_s18  ;;  %s4039_s22 = sadd.s32 4294967295, %s3920_s21   ;;  %s3920_s21 = sphi %s4024_s21, %s4996_s21   ;;  %s3916_s20 = sphi %s4022_s20, %s4999_s20   ;;  %s3912_s19 = sphi %s4020_s19, %s4998_s19   ;;  %s3908_s18 = sphi %s4018_s18, %s4997_s18  }
   0xd   : > { %4960 = sst [smem:[#allocation21_spill]] %s3912_s19  ;;  %s2700_s23 = sadd.s32 4294967294, %s3920_s21  }
   0xe   : > { %4961 = sst [smem:[#allocation22_spill]] %s3916_s20  ;;  %s4043_s24 = sadd.s32 1, %s3920_s21  }
   0xf   : > { %4962 = sst [smem:[#allocation23_spill]] %s3920_s21  ;;  %s359_s25 = sadd.s32 1, %s3916_s20 }
  0x10   : > { %4963 = sst [smem:[#allocation24_spill]] %s4043_s24  ;;  %s356_s26 = ssub.s32 %s3920_s21, %s4043_s24 }
  0x11   : > { %p369_p0 = scmp.ne.s32.totalorder %s3916_s20, %s3912_s19  ;;  %p357_p1 = scmp.eq.s32.totalorder %s356_s26, 0 }
  0x12   : > { %p370_p2 = scmp.eq.s32.totalorder %s4039_s22, 1  ;;  %p375_p3 = scmp.ne.s32.totalorder %s3912_s19, %s3908_s18 }
  0x13   : > { %p376_p4 = scmp.eq.s32.totalorder %s2700_s23, 1  ;;  %p2701_p7 = scmp.ge.s32.totalorder %s3920_s21, 1 }
  0x14   : > { %s4054_s27 = scalar_select %p357_p1, %s3916_s20, %s359_s25  }
  0x15   : > { %p4056_p5 = por %p370_p2, %p369_p0  ;;  %p4060_p6 = por %p376_p4, %p375_p3 }
  0x16   : > { %4964 = sst [smem:[#allocation25_spill]] %s4054_s27  ;;  %p383_p8 = scmp.lt.s32.totalorder %s3920_s21, 3 }
  0x17   : > { %s4965_s28 = scalar_select %p4056_p5, 1, 0 }
  0x18   : > { %s4967_s29 = scalar_select %p4060_p6, 1, 0 }
  0x19   : > { %4966 = sst [smem:[#allocation26_spill]] %s4965_s28  ;;  %p4946_p9 = scmp.eq.s32.totalorder %s4039_s22, 0 }
  0x1a   : > { %4968 = sst [smem:[#allocation27_spill]] %s4967_s29  ;;  %p4067_p10 = pnand %p2701_p7, %p383_p8 }
  0x1b   : > { %s3922_s16 = smov [#allocation5]   ;;  %s3923_s25 = smov [#allocation8]  }
  0x1c   : > { %s4969_s30 = scalar_select %p4067_p10, 1, 0 }
  0x1d   : > { %s415_s17 = sshll.u32 %s3922_s16, 4  ;;  %p3558_p11 = pneg %p4067_p10  ;;  %s4073_s17 = int_to_ptr.vmem [resolvable:$true] %s415_s17 }
  0x1e   : > { %s442_s26 = sshll.u32 %s3923_s25, 4  ;;  %s3924_s27 = smov [#allocation11]   ;;  %s4081_s26 = int_to_ptr.vmem [resolvable:$true] %s442_s26 }
  0x1f   : > { %p4077_p12 = pnand %p4946_p9, %p3558_p11  ;;  %s4083_s20 = sshll.u32 %s3924_s27, 4  ;;  %s470_s20 = int_to_ptr.vmem [resolvable:$true] %s4083_s20 }
  0x20   : > { %s3646_s16 = scalar_lea.hbm %s4928_s5, 256 }
  0x21   : > { %p3647_p13 = scmp.ne.s32.totalorder %s4928_s5, %s3646_s16  ;;  %p4093_p0 = pneg %p4077_p12 }
  0x22   : > { %p3653_p3 = scmp.lt.u32.totalorder %s3646_s16, %s4928_s5 }
  0x23   : > { %p3649_p1 = pnand %p4093_p0, %p3647_p13 }
  0x25   : > { %p3650_p2 = pneg %p3649_p1 }
  0x27   : > { %p3655_p4 = pnand %p3653_p3, %p3650_p2 }
  0x29   : > { %3658 = shalt.err (!%p3655_p4)
}
  0x2a   : > { %s3659_s18 = scalar_lea.vmem %s4073_s17, 256  ;;  %p3667_p9 = scmp.lt.s32.totalorder %s4073_s17, %s4073_s17 }
  0x2b   : > { %p3660_p7 = scmp.ne.s32.totalorder %s4073_s17, %s3659_s18  ;;  %p3668_p6 = scmp.lt.s32.totalorder %s3659_s18, %s3659_s18 }
  0x2d   : > { %p3662_p8 = pnand %p3660_p7, %p4093_p0  ;;  %p3669_p13 = por %p3668_p6, %p3667_p9 }
  0x2f   : > { %p3663_p11 = pneg %p3662_p8 }
  0x31   : > { %p3670_p1 = pnand %p3669_p13, %p3663_p11 }
  0x33   : > { %3673 = shalt.err (!%p3670_p1)
}
  0x34   : > { %s4953_s21 = smov 128   ;;  %s3926_s24 = smov 8  }
  0x35   : > { %3564 = dma.hbm_to_vmem [thread:$0]  (!%p4077_p12), %s4928_s5, 256, %s4073_s17, [#allocation6], %s4953_s21, %s4953_s21, %s3926_s24  }
  0x36   : > { %s3674_s18 = scalar_lea.hbm %s4930_s7, 64 }
  0x37   : > { %p3675_p6 = scmp.ne.s32.totalorder %s4930_s7, %s3674_s18  ;;  %p3681_p3 = scmp.lt.u32.totalorder %s3674_s18, %s4930_s7 }
  0x39   : > { %p3677_p9 = pnand %p3675_p6, %p4093_p0 }
  0x3b   : > { %p3678_p2 = pneg %p3677_p9 }
  0x3d   : > { %p3683_p4 = pnand %p3681_p3, %p3678_p2 }
  0x3f   : > { %3686 = shalt.err (!%p3683_p4)
}
  0x40   : > { %s3687_s17 = scalar_lea.vmem %s4081_s26, 64  ;;  %p3695_p13 = scmp.lt.s32.totalorder %s4081_s26, %s4081_s26 }
  0x41   : > { %p3688_p7 = scmp.ne.s32.totalorder %s4081_s26, %s3687_s17  ;;  %p3696_p1 = scmp.lt.s32.totalorder %s3687_s17, %s3687_s17 }
  0x43   : > { %p3690_p8 = pnand %p3688_p7, %p4093_p0  ;;  %p3697_p6 = por %p3696_p1, %p3695_p13 }
  0x45   : > { %p3691_p11 = pneg %p3690_p8 }
  0x47   : > { %p3698_p9 = pnand %p3697_p6, %p3691_p11 }
  0x49   : > { %3701 = shalt.err (!%p3698_p9)
}
  0x4a   : > { %3570 = dma.hbm_to_vmem [thread:$0]  (!%p4077_p12), %s4930_s7, 64, %s4081_s26, [#allocation9]  }
  0x4b   : > { %s3702_s29 = scalar_lea.hbm %s4933_s10, 16 }
  0x4c   : > { %p3703_p2 = scmp.ne.s32.totalorder %s4933_s10, %s3702_s29  ;;  %p3709_p7 = scmp.lt.u32.totalorder %s3702_s29, %s4933_s10 }
  0x4e   : > { %p3705_p3 = pnand %p3703_p2, %p4093_p0 }
  0x50   : > { %p3706_p4 = pneg %p3705_p3 }
  0x52   : > { %p3711_p8 = pnand %p3709_p7, %p3706_p4 }
  0x54   : > { %3714 = shalt.err (!%p3711_p8)
}
  0x55   : > { %s3715_s17 = scalar_lea.vmem %s470_s20, 16  ;;  %s3722_s26 = scalar_lea.vmem %s470_s20, 32 }
  0x56   : > { %p3716_p11 = scmp.ne.s32.totalorder %s470_s20, %s3715_s17  ;;  %p3723_p6 = scmp.lt.s32.totalorder %s470_s20, %s470_s20 }
  0x57   : > { %p3724_p9 = scmp.lt.s32.totalorder %s3722_s26, %s3715_s17 }
  0x58   : > { %p3718_p13 = pnand %p3716_p11, %p4093_p0 }
  0x59   : > { %p3725_p5 = por %p3724_p9, %p3723_p6 }
  0x5a   : > { %p3719_p1 = pneg %p3718_p13 }
  0x5c   : > { %p3726_p10 = pnand %p3725_p5, %p3719_p1 }
  0x5e   : > { %3729 = shalt.err (!%p3726_p10)
}
  0x5f   : > { %3576 = dma.hbm_to_vmem [thread:$0]  (!%p4077_p12), %s4933_s10, 16, %s470_s20, [#allocation12]  }
  0x60   : > { %s3927_s19 = smov [#allocation2]   ;;  %s3928_s29 = smov [#allocation7]  }
  0x61   : > { %s399_s28 = sshll.u32 %s3927_s19, 4  ;;  %s428_s16 = sshll.u32 %s3928_s29, 4  ;;  %s400_s28 = int_to_ptr.vmem [resolvable:$true] %s399_s28  ;;  %s429_s16 = int_to_ptr.vmem [resolvable:$true] %s428_s16 }
  0x62   : > { %s4972_s2 = sld [smem:[#allocation28_spill]] }
  0x68   : > { %s3730_s18 = scalar_lea.hbm %s4972_s2, 32 }
  0x69   : > { %p3731_p5 = scmp.ne.s32.totalorder %s4972_s2, %s3730_s18  ;;  %p3737_p3 = scmp.lt.u32.totalorder %s3730_s18, %s4972_s2 }
  0x6b   : > { %p3733_p10 = pnand %p3731_p5, %p4093_p0 }
  0x6d   : > { %p3734_p2 = pneg %p3733_p10 }
  0x6f   : > { %p3739_p4 = pnand %p3737_p3, %p3734_p2 }
  0x71   : > { %3742 = shalt.err (!%p3739_p4)
}
  0x72   : > { %s3743_s20 = scalar_lea.vmem %s400_s28, 32  ;;  %p3751_p13 = scmp.lt.s32.totalorder %s400_s28, %s400_s28 }
  0x73   : > { %p3744_p7 = scmp.ne.s32.totalorder %s400_s28, %s3743_s20  ;;  %p3752_p1 = scmp.lt.s32.totalorder %s3743_s20, %s3743_s20 }
  0x75   : > { %p3746_p8 = pnand %p3744_p7, %p4093_p0  ;;  %p3753_p6 = por %p3752_p1, %p3751_p13 }
  0x77   : > { %p3747_p11 = pneg %p3746_p8 }
  0x79   : > { %p3754_p9 = pnand %p3753_p6, %p3747_p11 }
  0x7b   : > { %3757 = shalt.err (!%p3754_p9)
}
  0x7c   : > { %3561 = dma.hbm_to_vmem [thread:$0]  (!%p4077_p12), %s4972_s2, 32, %s400_s28, [#allocation3]  }
  0x7d   : > { %s3758_s25 = scalar_lea.hbm %s4929_s6, 2304 }
  0x7e   : > { %p3759_p5 = scmp.ne.s32.totalorder %s4929_s6, %s3758_s25  ;;  %p3765_p3 = scmp.lt.u32.totalorder %s3758_s25, %s4929_s6 }
  0x80   : > { %p3761_p10 = pnand %p3759_p5, %p4093_p0 }
  0x82   : > { %p3762_p2 = pneg %p3761_p10 }
  0x84   : > { %p3767_p4 = pnand %p3765_p3, %p3762_p2 }
  0x86   : > { %3770 = shalt.err (!%p3767_p4)
}
  0x87   : > { %s3771_s13 = scalar_lea.vmem %s429_s16, 2304  ;;  %p3779_p13 = scmp.lt.s32.totalorder %s429_s16, %s429_s16 }
  0x88   : > { %p3772_p7 = scmp.ne.s32.totalorder %s429_s16, %s3771_s13  ;;  %p3780_p1 = scmp.lt.s32.totalorder %s3771_s13, %s3771_s13 }
  0x8a   : > { %p3774_p8 = pnand %p3772_p7, %p4093_p0  ;;  %p3781_p6 = por %p3780_p1, %p3779_p13 }
  0x8c   : > { %p3775_p11 = pneg %p3774_p8 }
  0x8e   : > { %p3782_p9 = pnand %p3781_p6, %p3775_p11 }
  0x90   : > { %3785 = shalt.err (!%p3782_p9)
}
  0x91   : > { %s4973_s28 = smov 128   ;;  %s3929_s19 = smov [#allocation10]  }
  0x92   : > { %3567 = dma.hbm_to_vmem [thread:$0]  (!%p4077_p12), %s4929_s6, 2304, %s429_s16, [#allocation6], %s4973_s28, %s4973_s28, %s3926_s24  }
  0x93   : > { %s455_s21 = sshll.u32 %s3929_s19, 4  ;;  %s3930_s29 = smov [#allocation13]   ;;  %s456_s21 = int_to_ptr.vmem [resolvable:$true] %s455_s21 }
  0x94   : > { %s483_s25 = sshll.u32 %s3930_s29, 4  ;;  %s3786_s17 = scalar_lea.hbm %s4932_s9, 4096  ;;  %s484_s25 = int_to_ptr.vmem [resolvable:$true] %s483_s25 }
  0x95   : > { %p3787_p5 = scmp.ne.s32.totalorder %s4932_s9, %s3786_s17  ;;  %p3793_p3 = scmp.lt.u32.totalorder %s3786_s17, %s4932_s9 }
  0x97   : > { %p3789_p10 = pnand %p3787_p5, %p4093_p0 }
  0x99   : > { %p3790_p2 = pneg %p3789_p10 }
  0x9b   : > { %p3795_p4 = pnand %p3793_p3, %p3790_p2 }
  0x9d   : > { %3798 = shalt.err (!%p3795_p4)
}
  0x9e   : > { %s3799_s16 = scalar_lea.vmem %s456_s21, 4096  ;;  %p3807_p13 = scmp.lt.s32.totalorder %s456_s21, %s456_s21 }
  0x9f   : > { %p3800_p7 = scmp.ne.s32.totalorder %s456_s21, %s3799_s16  ;;  %p3808_p1 = scmp.lt.s32.totalorder %s3799_s16, %s3799_s16 }
  0xa1   : > { %p3802_p8 = pnand %p3800_p7, %p4093_p0  ;;  %p3809_p6 = por %p3808_p1, %p3807_p13 }
  0xa3   : > { %p3803_p11 = pneg %p3802_p8 }
  0xa5   : > { %p3810_p9 = pnand %p3809_p6, %p3803_p11 }
  0xa7   : > { %3813 = shalt.err (!%p3810_p9)
}
  0xa8   : > { %3573 = dma.hbm_to_vmem [thread:$0]  (!%p4077_p12), %s4932_s9, 4096, %s456_s21, [#allocation9], %s4973_s28, %s4973_s28, %s3926_s24  }
  0xa9   : > { %s3814_s27 = scalar_lea.hbm %s4935_s12, 16 }
  0xaa   : > { %p3815_p5 = scmp.ne.s32.totalorder %s4935_s12, %s3814_s27  ;;  %p3821_p3 = scmp.lt.u32.totalorder %s3814_s27, %s4935_s12 }
  0xac   : > { %p3817_p10 = pnand %p3815_p5, %p4093_p0 }
  0xae   : > { %p3818_p2 = pneg %p3817_p10 }
  0xb0   : > { %p3823_p4 = pnand %p3821_p3, %p3818_p2 }
  0xb2   : > { %3826 = shalt.err (!%p3823_p4)
}
  0xb3   : > { %s3827_s20 = scalar_lea.vmem %s484_s25, 16  ;;  %s3834_s24 = scalar_lea.vmem %s484_s25, 32 }
  0xb4   : > { %p3828_p7 = scmp.ne.s32.totalorder %s484_s25, %s3827_s20  ;;  %p3835_p13 = scmp.lt.s32.totalorder %s484_s25, %s484_s25 }
  0xb5   : > { %p3836_p1 = scmp.lt.s32.totalorder %s3834_s24, %s3827_s20 }
  0xb6   : > { %p3830_p8 = pnand %p3828_p7, %p4093_p0 }
  0xb7   : > { %p3837_p6 = por %p3836_p1, %p3835_p13 }
  0xb8   : > { %p3831_p11 = pneg %p3830_p8 }
  0xba   : > { %p3838_p9 = pnand %p3837_p6, %p3831_p11 }
  0xbc   : > { %3841 = shalt.err (!%p3838_p9)
}
  0xbd   : > { %3579 = dma.hbm_to_vmem [thread:$0]  (!%p4077_p12), %s4935_s12, 16, %s484_s25, [#allocation12]  }
  0xbe   : > { %p4974_p5 = scmp.ne.s32.totalorder %s4969_s30, 0 }
  0xbf   : > { %p4975_p10 = scmp.eq.s32.totalorder (!%p4974_p5), %s4039_s22, 0 }
  0xc0   : > { %510 = sbr.rel (%p4974_p5) target bundleno = 2569 (0xa09), region = 80 }
  0xc7   : > { %3887 = dma.done.wait (%p4975_p10), [#allocation3], 32   ;;  %p4976_p0 = pmov %p4975_p10 }
  0xc9   : > { %3889 = vsyncadd (%p4976_p0), [#allocation3], 4294967264  ;;  %p4977_p2 = pmov %p4976_p0 }
  0xca   : > { %p4978_p3 = pmov %p4976_p0 }
  0xcb   : > { %3891 = dma.done.wait (%p4977_p2), [#allocation6], 2560  }
  0xcc   : > { %3893 = vsyncadd (%p4978_p3), [#allocation6], 4294964736  ;;  %p4979_p4 = pmov %p4976_p0 }
  0xcd   : > { %p4980_p12 = pmov %p4976_p0 }
  0xce   : > { %3895 = dma.done.wait (%p4979_p4), [#allocation9], 4160  }
  0xcf   : > { %3897 = vsyncadd (%p4980_p12), [#allocation9], 4294963136  ;;  %p4981_p7 = pmov %p4976_p0 }
  0xd0   : > { %p4982_p8 = pmov %p4976_p0 }
  0xd1   : > { %3899 = dma.done.wait (%p4981_p7), [#allocation12], 32  }
  0xd2   : > { %3901 = vsyncadd (%p4982_p8), [#allocation12], 4294967264  ;;  %p581_p11 = scmp.lt.s32.totalorder %s4039_s22, 1  ;;  %v3931_v0 = vmov 0.0   ;;  %vm626_vm0 = vcmask 1043456   ;;  %vm3932_vm1 = vmmov 1  }
  0xd3   : > { %697 = vmatprep.mubr.f32.mxu0 %v3931_v0  ;;  %709 = vmatprep.mubr.f32.mxu1 %v3931_v0  ;;  %vm4261_vm2 = vmpackc.low %vm626_vm0, %vm3932_vm1  ;;  %v2721_v2 = vld [vmem:[%s4924_s1 + $0x48] sm:$0xff]  ;;  %v2723_v3 = vld [vmem:[%s4924_s1 + $0x58] sm:$0xff]  ;;  %vm611_vm3 = vcmask 1046528   ;;  %vm619_vm4 = vcmask 228352   ;;  %vm820_vm5 = vcmask 1045504   ;;  %vm938_vm6 = vcmask 1044480  }
  0xd4   : > { %s582_s15 = scalar_select %p581_p11, %s4039_s22, 1  ;;  %v2720_v4 = vld [vmem:[%s4924_s1 + $0x40] sm:$0xff]  ;;  %v3246_v5 = vpack.c.bf16 %v2723_v3, %v2721_v2  ;;  %v2722_v6 = vld [vmem:[%s4924_s1 + $0x50] sm:$0xff]  ;;  %v2725_v7 = vld [vmem:[%s4924_s1 + $0x68] sm:$0xff]  ;;  %vm1218_vm7 = vcmask 187392   ;;  %vm1356_vm8 = vcmask 1041408  }
  0xd5   : > { %v2727_v8 = vld [vmem:[%s4924_s1 + $0x78] sm:$0xf]  ;;  %v3248_v9 = vpack.c.bf16 %v2722_v6, %v2720_v4  ;;  %v2724_v11 = vld [vmem:[%s4924_s1 + $0x60] sm:$0xff]  ;;  %v2726_v12 = vld [vmem:[%s4924_s1 + $0x70] sm:$0xf]  ;;  %s3934_s2 = smov 122  }
  0xd6   : > { %s2839_s30 = sshll.u32 %s582_s15, 5  ;;  %v3250_v10 = vpack.c.bf16 %v2727_v8, %v2725_v7  ;;  %3247 = vmatprep.subr.bf16.mxu0 %v3246_v5  ;;  %v591_v15 = vld [vmem:[%s4924_s1 + $0x8] sm:$0xff]  ;;  %v593_v16 = vld [vmem:[%s4924_s1 + $0x18] sm:$0xff]  ;;  %3493 = vmatprep.subr.bf16.mxu1 %v3246_v5  ;;  %v3253_v17 = vpack.c.bf16 %v2726_v12, %v2724_v11  ;;  %v590_v21 = vld [vmem:[%s4924_s1] sm:$0xff]  ;;  %vm1320_vm10 = vcmask 998400   ;;  %vm1349_vm11 = vcmask 80896  }
  0xd7   : > { %s4268_s16 = scalar_lea.vmem %s4923_s0, %s2839_s30  ;;  %3249 = vmatpush1.bf16.msra.mxu0 %v3248_v9  ;;  %3495 = vmatpush1.bf16.msra.mxu1 %v3248_v9  ;;  %v3256_v20 = vpack.c.bf16 %v593_v16, %v591_v15  ;;  %v592_v22 = vld [vmem:[%s4924_s1 + $0x10] sm:$0xff]  ;;  %v595_v24 = vld [vmem:[%s4924_s1 + $0x28] sm:$0xff]  ;;  %v597_v25 = vld [vmem:[%s4924_s1 + $0x38] sm:$0xf]  ;;  %vm3935_vm12 = vmmov 0   ;;  %vm1459_vm13 = vcmask 588800  }
  0xd8   : > { %v4295_v13 = vld [vmem:[%s4268_s16] sm:$0xff]  ;;  %v4298_v14 = vld [vmem:[%s4268_s16 + $0x8] sm:$0xff]  ;;  %3252 = vmatprep.subr.msk.bf16.mxu0 %vm4261_vm2, %v3250_v10  ;;  %v4317_v23 = vld [vmem:[%s4268_s16 + $0x10] sm:$0xff]  ;;  %3494 = vmatprep.subr.msk.bf16.mxu1 %vm4261_vm2, %v3250_v10  ;;  %v3258_v27 = vpack.c.bf16 %v592_v22, %v590_v21  ;;  %v3260_v29 = vpack.c.bf16 %v597_v25, %v595_v24  ;;  %vm1876_vm14 = vcmask 56320   ;;  %s3936_s18 = smov 112   ;;  %vm1972_vm15 = vcmask 916480  }
  0xd9   : > { %v612_v18 = vrot.slane %v4295_v13, 1  ;;  %v613_v19 = vrot.slane %v4298_v14, 1  ;;  %v615_v28 = vrot.slane %v4317_v23, 1  ;;  %v594_v30 = vld [vmem:[%s4924_s1 + $0x20] sm:$0xff]  ;;  %v596_v31 = vld [vmem:[%s4924_s1 + $0x30] sm:$0xf]  ;;  %vm3326_vm9 = vmpackc.low %vm1356_vm8, %vm3932_vm1 }
  0xda   : > { %v2739_v32 = vld [vmem:[%s4924_s1 + $0x88] sm:$0xff]  ;;  %v2741_v33 = vld [vmem:[%s4924_s1 + $0x98] sm:$0xff]  ;;  %v3263_v35 = vpack.c.bf16 %v596_v31, %v594_v30  ;;  %v2738_v38 = vld [vmem:[%s4924_s1 + $0x80] sm:$0xff]  ;;  %v821_v52 = vrot.slane %v4295_v13, 2  ;;  %v822_v53 = vrot.slane %v4298_v14, 2  ;;  %v824_v60 = vrot.slane %v4317_v23, 2 }
  0xdb   : > { %3255 = vmatpush1.bf16.msk.msra.mxu0 %vm4261_vm2, %v3253_v17  ;;  %v614_v26 = vsel %vm611_vm3, %v612_v18, %v613_v19  ;;  %3496 = vmatpush1.bf16.msk.msra.mxu1 %vm4261_vm2, %v3253_v17  ;;  %v616_v34 = vsel %vm611_vm3, %v613_v19, %v615_v28  ;;  %v4349_v36 = vld [vmem:[%s4268_s16 + $0x18] sm:$0xf]  ;;  %v3266_v37 = vpack.c.bf16 %v2741_v33, %v2739_v32  ;;  %v2740_v39 = vld [vmem:[%s4924_s1 + $0x90] sm:$0xff]  ;;  %v2743_v41 = vld [vmem:[%s4924_s1 + $0xa8] sm:$0xff]  ;;  %v939_v9 = vrot.slane %v4295_v13, 3  ;;  %s4985_s19 = sld [smem:[#allocation29_spill]] }
  0xdc   : > { %3257 = vmatprep.subr.bf16.mxu0 %v3256_v20  ;;  %v617_v40 = vrot.slane %v4349_v36, 1  ;;  %v2745_v42 = vld [vmem:[%s4924_s1 + $0xb8] sm:$0xf]  ;;  %v3268_v44 = vpack.c.bf16 %v2740_v39, %v2738_v38  ;;  %v2742_v46 = vld [vmem:[%s4924_s1 + $0xa0] sm:$0xff]  ;;  %v2744_v47 = vld [vmem:[%s4924_s1 + $0xb0] sm:$0xf]  ;;  %v823_v58 = vsel %vm820_vm5, %v821_v52, %v822_v53  ;;  %v825_v4 = vsel %vm820_vm5, %v822_v53, %v824_v60 }
  0xdd   : > { %v3270_v45 = vpack.c.bf16 %v2745_v42, %v2743_v41  ;;  %v2752_v48 = vld [vmem:[%s4924_s1 + $0xc8] sm:$0xff]  ;;  %v2754_v49 = vld [vmem:[%s4924_s1 + $0xd8] sm:$0xff]  ;;  %v3273_v50 = vpack.c.bf16 %v2744_v47, %v2742_v46  ;;  %v2751_v54 = vld [vmem:[%s4924_s1 + $0xc0] sm:$0xff]  ;;  %v826_v5 = vrot.slane %v4349_v36, 2  ;;  %v940_v10 = vrot.slane %v4298_v14, 3  ;;  %s4988_s24 = sld [smem:[#allocation30_spill]] }
  0xde   : > { %2730 = vmatmul.mubr.msk.f32.vlgmr.msra.gmra.mrb[0].mxu0 %vm619_vm4, %v614_v26  ;;  %v618_v43 = vsel %vm611_vm3, %v615_v28, %v617_v40  ;;  %v3276_v51 = vpack.c.bf16 %v2754_v49, %v2752_v48  ;;  %v2753_v55 = vld [vmem:[%s4924_s1 + $0xd0] sm:$0xff]  ;;  %v2756_v56 = vld [vmem:[%s4924_s1 + $0xe8] sm:$0xff]  ;;  %v2758_v57 = vld [vmem:[%s4924_s1 + $0xf8] sm:$0xf]  ;;  %v942_v19 = vrot.slane %v4317_v23, 3  ;;  %v944_v25 = vrot.slane %v4349_v36, 3 }
  0xdf   : > { %3259 = vmatpush1.bf16.msra.mxu0 %v3258_v27  ;;  %703 = vmatprep.mubr.f32.mxu0 %v3931_v0  ;;  %v3278_v59 = vpack.c.bf16 %v2753_v55, %v2751_v54  ;;  %v3280_v61 = vpack.c.bf16 %v2758_v57, %v2756_v56  ;;  %v2755_v62 = vld [vmem:[%s4924_s1 + $0xe0] sm:$0xff]  ;;  %v2757_v63 = vld [vmem:[%s4924_s1 + $0xf0] sm:$0xf]  ;;  %v2765_v2 = vld [vmem:[%s4924_s1 + $0x108] sm:$0xff]  ;;  %v827_v8 = vsel %vm820_vm5, %v824_v60, %v826_v5  ;;  %v1056_v28 = vrot.slane %v4295_v13, 4  ;;  %s4989_s28 = sld [smem:[#allocation26_spill]] }
  0xe0   : > { %3262 = vmatprep.subr.msk.bf16.mxu0 %vm4261_vm2, %v3260_v29  ;;  %2732 = vmatmul.mubr.msk.f32.vlgmr.msra.gmra.mrb[0].mxu1 %vm619_vm4, %v618_v43  ;;  %v2767_v3 = vld [vmem:[%s4924_s1 + $0x118] sm:$0xff]  ;;  %v3283_v6 = vpack.c.bf16 %v2757_v63, %v2755_v62  ;;  %v2764_v11 = vld [vmem:[%s4924_s1 + $0x100] sm:$0xff]  ;;  %v2766_v12 = vld [vmem:[%s4924_s1 + $0x110] sm:$0xff]  ;;  %v941_v17 = vsel %vm938_vm6, %v939_v9, %v940_v10  ;;  %v943_v24 = vsel %vm938_vm6, %v940_v10, %v942_v19  ;;  %v1057_v29 = vrot.slane %v4298_v14, 4  ;;  %s2836_s21 = sshll.u32 %s4039_s22, 4  ;;  %s4990_s14 = sld [smem:[#allocation31_spill]] }
  0xe1   : > { %1295 = vmatprep.mubr.f32.mxu1 %v3931_v0  ;;  %v3286_v7 = vpack.c.bf16 %v2767_v3, %v2765_v2  ;;  %v2769_v15 = vld [vmem:[%s4924_s1 + $0x128] sm:$0xff]  ;;  %v2771_v16 = vld [vmem:[%s4924_s1 + $0x138] sm:$0xf]  ;;  %v3288_v18 = vpack.c.bf16 %v2766_v12, %v2764_v11  ;;  %v2768_v21 = vld [vmem:[%s4924_s1 + $0x120] sm:$0xff]  ;;  %v945_v27 = vsel %vm938_vm6, %v942_v19, %v944_v25  ;;  %v1059_v31 = vrot.slane %v4317_v23, 4  ;;  %s4986_s29 = smov %s4985_s19  ;;  %s3937_s22 = smov [#allocation14]  }
  0xe2   : > { %2731 = vmatmul.mubr.msk.f32.gmra.mrb[2].mxu0 %vm619_vm4, %v616_v34  ;;  %v3290_v20 = vpack.c.bf16 %v2771_v16, %v2769_v15  ;;  %v2770_v22 = vld [vmem:[%s4924_s1 + $0x130] sm:$0xf]  ;;  %v1058_v30 = vsel %vm626_vm0, %v1056_v28, %v1057_v29  ;;  %v1061_v1 = vrot.slane %v4349_v36, 4  ;;  %v1166_v34 = vlaneseq  ;;  %v1217_v19 = vld [vmem:[#allocation5 + $0x8] sm:$0xf] }
  0xe3   : > { %3265 = vmatpush1.bf16.msk.msra.mxu0 %vm4261_vm2, %v3263_v35  ;;  %792 = vmatprep.mubr.f32.mxu0 %v3931_v0  ;;  %v3293_v26 = vpack.c.bf16 %v2770_v22, %v2768_v21  ;;  %v1060_v32 = vsel %vm626_vm0, %v1057_v29, %v1059_v31  ;;  %v1332_v21 = vld [vmem:[#allocation7 + $0x8] sm:$0xff]  ;;  %v1333_v22 = vld [vmem:[#allocation7 + $0x10] sm:$0xff]  ;;  %v1335_v28 = vld [vmem:[#allocation7 + $0x20] sm:$0xff]  ;;  %vm2055_vm1 = vcmask 523264  }
  0xe4   : > { %3267 = vmatprep.subr.bf16.mxu0 %v3266_v37  ;;  %v1164_v37 = vld [vmem:[#allocation2] sm:$0x3] }
  0xe5   : > { %v1336_v29 = vld [vmem:[#allocation7 + $0x28] sm:$0xff]  ;;  %p4991_p1 = scmp.ne.s32.totalorder %s4989_s28, 0 }
  0xe6   : > { %2735 = vmatmul.mubr.msk.f32.vlgmr.msra.gmra.mrb[0].mxu0 %vm619_vm4, %v4295_v13  ;;  %v1062_v13 = vsel %vm626_vm0, %v1059_v31, %v1061_v1  ;;  %v1337_v31 = vld [vmem:[#allocation7 + $0x30] sm:$0xff] }
  0xe7   : > { %798 = vmatprep.mubr.f32.mxu0 %v3931_v0  ;;  %3269 = vmatpush1.bf16.msra.mxu0 %v3268_v44 }
  0xe8   : > { %3272 = vmatprep.subr.msk.bf16.mxu0 %vm4261_vm2, %v3270_v45 }
  0xea   : > { %2736 = vmatmul.mubr.msk.f32.gmra.mrb[2].mxu0 %vm619_vm4, %v4298_v14 }
  0xeb   : > { %804 = vmatprep.mubr.f32.mxu0 %v3931_v0  ;;  %3275 = vmatpush1.bf16.msk.msra.mxu0 %vm4261_vm2, %v3273_v50 }
  0xec   : > { %3277 = vmatprep.subr.bf16.mxu0 %v3276_v51 }
  0xee   : > { %2737 = vmatmul.mubr.msk.f32.gmra.mrb[4].mxu0 %vm619_vm4, %v4317_v23  ;;  %v1167_v23 = vshrl.u32 %v1166_v34, 7  ;;  %v1341_v34 = vld [vmem:[#allocation7 + $0x50] sm:$0xff] }
  0xef   : > { %904 = vmatprep.mubr.f32.mxu0 %v3931_v0 }
  0xf0   : > { %v1168_v35 = vsub.s32 0, %v1167_v23  ;;  %v1172_v38 = vsub.s32 1, %v1167_v23  ;;  %v1342_v23 = vld [vmem:[#allocation7 + $0x58] sm:$0xff] }
  0xf2   : > { %2748 = vmatmul.mubr.msk.f32.vlgmr.msra.gmra.mrb[0].mxu0 %vm619_vm4, %v823_v58  ;;  %v1169_v39 = vrot.slane %v1164_v37, %v1168_v35  ;;  %v1173_v40 = vrot.slane %v1164_v37, %v1172_v38  ;;  %v3316_v35 = vpack.c.bf16 %v1342_v23, %v1341_v34  ;;  %v1343_v37 = vld [vmem:[#allocation7 + $0x60] sm:$0xff]  ;;  %v1344_v38 = vld [vmem:[#allocation7 + $0x68] sm:$0xff] }
  0xf3   : > { %910 = vmatprep.mubr.f32.mxu0 %v3931_v0  ;;  %3279 = vmatpush1.bf16.msra.mxu0 %v3278_v59  ;;  %v2809_v23 = vld [vmem:[%s4926_s3 + $0xf8] sm:$0xff] }
  0xf4   : > { %3282 = vmatprep.subr.msk.bf16.mxu0 %vm4261_vm2, %v3280_v61 }
  0xf6   : > { %2749 = vmatmul.mubr.msk.f32.gmra.mrb[2].mxu0 %vm619_vm4, %v825_v4 }
  0xf7   : > { %916 = vmatprep.mubr.f32.mxu0 %v3931_v0  ;;  %3285 = vmatpush1.bf16.msk.msra.mxu0 %vm4261_vm2, %v3283_v6 }
  0xf8   : > { %3287 = vmatprep.subr.bf16.mxu0 %v3286_v7 }
  0xfa   : > { %2750 = vmatmul.mubr.msk.f32.gmra.mrb[4].mxu0 %vm619_vm4, %v827_v8 }
  0xfb   : > { %1022 = vmatprep.mubr.f32.mxu0 %v3931_v0 }
  0xfe   : > { %2761 = vmatmul.mubr.msk.f32.vlgmr.msra.gmra.mrb[0].mxu0 %vm619_vm4, %v941_v17 }
  0xff   : > { %1028 = vmatprep.mubr.f32.mxu0 %v3931_v0  ;;  %3289 = vmatpush1.bf16.msra.mxu0 %v3288_v18  ;;  %v1216_v18 = vld [vmem:[#allocation5] sm:$0xff] }
 0x100   : > { %3292 = vmatprep.subr.msk.bf16.mxu0 %vm4261_vm2, %v3290_v20  ;;  %v1331_v20 = vld [vmem:[#allocation7] sm:$0xff] }
 0x101   : > { %v3301_v25 = vpack.c.bf16 %v1332_v21, %v1331_v20  ;;  %v2790_v21 = vld [vmem:[%s4926_s3 + $0x78] sm:$0xff] }
 0x102   : > { %2762 = vmatmul.mubr.msk.f32.gmra.mrb[2].mxu0 %vm619_vm4, %v943_v24  ;;  %v3933_v24 = vmov 0.0|0.0  }
 0x103   : > { %1034 = vmatprep.mubr.f32.mxu0 %v3931_v0  ;;  %3295 = vmatpush1.bf16.msk.msra.mxu0 %vm4261_vm2, %v3293_v26  ;;  %v1334_v26 = vld [vmem:[#allocation7 + $0x18] sm:$0xff]  ;;  %vm2396_vm2 = vcmask 982016  }
 0x104   : > { %3340 = vmatprep.subr.bf16.mxu0 %v3933_v24 }
 0x106   : > { %2763 = vmatmul.mubr.msk.f32.gmra.mrb[4].mxu0 %vm619_vm4, %v945_v27  ;;  %v3304_v27 = vpack.c.bf16 %v1334_v26, %v1333_v22  ;;  %v2791_v22 = vld [vmem:[%s4926_s3 + $0x80] sm:$0xff]  ;;  %v2792_v26 = vld [vmem:[%s4926_s3 + $0x88] sm:$0xff] }
 0x107   : > { %1139 = vmatprep.mubr.f32.mxu0 %v3931_v0 }
 0x10a   : > { %2774 = vmatmul.mubr.msk.f32.vlgmr.msra.gmra.mrb[0].mxu0 %vm619_vm4, %v1058_v30  ;;  %v3307_v30 = vpack.c.bf16 %v1336_v29, %v1335_v28  ;;  %v2806_v28 = vld [vmem:[%s4926_s3 + $0xe0] sm:$0xff] }
 0x10b   : > { %1145 = vmatprep.mubr.f32.mxu0 %v3931_v0 }
 0x10e   : > { %2775 = vmatmul.mubr.msk.f32.gmra.mrb[2].mxu0 %vm619_vm4, %v1060_v32  ;;  %v1338_v32 = vld [vmem:[#allocation7 + $0x38] sm:$0xff] }
 0x10f   : > { %1151 = vmatprep.mubr.f32.mxu0 %v3931_v0  ;;  %v3310_v1 = vpack.c.bf16 %v1338_v32, %v1337_v31  ;;  %v2808_v31 = vld [vmem:[%s4926_s3 + $0xf0] sm:$0xff] }
 0x112   : > { %2776 = vmatmul.mubr.msk.f32.gmra.mrb[4].mxu0 %vm619_vm4, %v1062_v13  ;;  %v1339_v13 = vld [vmem:[#allocation7 + $0x40] sm:$0xff] }
 0x113   : > { %3010 = vmatprep.mubr.msk.f32.mxu0 %vm3935_vm12, %v3931_v0 }
 0x1b3   : > { %v711_v14 = vpop.f32.mrb[0].mxu1 }
 0x1b4   : > { %v713_v33 = vpop.f32.mrb[1].mxu1 }
 0x1dd   : > { %v1141_v41 = vpop.f32.mrb[0].mxu0 }
 0x1de   : > { %v1176_v42 = vadd.f32 %v1169_v39, %v1141_v41  ;;  %v1143_v36 = vpop.f32.mrb[1].mxu0  ;;  %v1346_v41 = vld [vmem:[#allocation7 + $0x78] sm:$0xff] }
 0x1df   : > { %v1177_v43 = vadd.f32 %v1173_v40, %v1143_v36  ;;  %v1347_v36 = vld [vmem:[#allocation7 + $0x80] sm:$0xff] }
 0x1e0   : > { %v1182_v45 = vmax.f32 %v1176_v42, 0.0 }
 0x1e1   : > { %v1147_v44 = vpop.f32.mrb[2].mxu0  ;;  %v1183_v48 = vmax.f32 %v1177_v43, 0.0  ;;  %v1348_v43 = vld [vmem:[#allocation7 + $0x88] sm:$0x3] }
 0x1e2   : > { %v1178_v46 = vadd.f32 %v1169_v39, %v1147_v44  ;;  %v1149_v47 = vpop.f32.mrb[3].mxu0  ;;  %v1194_v53 = vrot.slane %v1182_v45, 1  ;;  %v3325_v44 = vpack.c.bf16 %v1348_v43, %v1347_v36 }
 0x1e3   : > { %v1179_v49 = vadd.f32 %v1173_v40, %v1149_v47  ;;  %v1197_v57 = vrot.slane %v1183_v48, 1  ;;  %v1437_v47 = vld [vmem:[%s4926_s3 + $0x10] sm:$0xff] }
 0x1e4   : > { %v1184_v50 = vmax.f32 %v1178_v46, 0.0  ;;  %v1436_v46 = vld [vmem:[%s4926_s3 + $0x8] sm:$0xff] }
 0x1e5   : > { %v1185_v51 = vmax.f32 %v1179_v49, 0.0  ;;  %v1153_v52 = vpop.f32.mrb[4].mxu0 }
 0x1e6   : > { %v1195_v54 = vrot.slane %v1184_v50, 1  ;;  %v3497_v55 = vadd.f32 %v1153_v52, %v711_v14  ;;  %v1155_v56 = vpop.f32.mrb[5].mxu0  ;;  %v1340_v14 = vld [vmem:[#allocation7 + $0x48] sm:$0xff] }
 0x1e7   : > { %v1198_v58 = vrot.slane %v1185_v51, 1  ;;  %v3498_v59 = vadd.f32 %v1155_v56, %v713_v33  ;;  %v3313_v33 = vpack.c.bf16 %v1340_v14, %v1339_v13  ;;  %v2796_v13 = vld [vmem:[%s4926_s3 + $0x98] sm:$0xff] }
 0x1e8   : > { %v1196_v60 = vsel %vm611_vm3, %v1194_v53, %v1195_v54  ;;  %v1180_v61 = vadd.f32 %v3497_v55, %v1169_v39  ;;  %v3319_v39 = vpack.c.bf16 %v1344_v38, %v1343_v37  ;;  %v1439_v53 = vld [vmem:[%s4926_s3 + $0x20] sm:$0xff] }
 0x1e9   : > { %v1210_v62 = vmax.f32 %v1182_v45, %v1196_v60  ;;  %v1181_v63 = vadd.f32 %v3498_v59, %v1173_v40  ;;  %v1199_v2 = vsel %vm611_vm3, %v1197_v57, %v1198_v58  ;;  %v1345_v40 = vld [vmem:[#allocation7 + $0x70] sm:$0xff]  ;;  %v1442_v59 = vld [vmem:[%s4926_s3 + $0x38] sm:$0xff] }
 0x1ea   : > { %v1186_v3 = vmax.f32 %v1180_v61, 0.0  ;;  %v1211_v4 = vmax.f32 %v1183_v48, %v1199_v2  ;;  %v3322_v42 = vpack.c.bf16 %v1346_v41, %v1345_v40  ;;  %v1435_v45 = vld [vmem:[%s4926_s3] sm:$0xff]  ;;  %v2785_v2 = vld [vmem:[%s4926_s3 + $0x50] sm:$0xff] }
 0x1eb   : > { %v1187_v5 = vmax.f32 %v1181_v63, 0.0  ;;  %v3341_v49 = vpack.c.bf16 %v1436_v46, %v1435_v45  ;;  %v1443_v61 = vld [vmem:[%s4926_s3 + $0x40] sm:$0xff]  ;;  %v2784_v63 = vld [vmem:[%s4926_s3 + $0x48] sm:$0xff] }
 0x1ec   : > { %v1200_v6 = vrot.slane %v1186_v3, 1 }
 0x1ed   : > { %v1202_v7 = vrot.slane %v1187_v5, 1  ;;  %3342 = vmatpush3.bf16.msra.mxu0 %v3341_v49 }
 0x1ee   : > { %v1201_v8 = vsel %vm611_vm3, %v1195_v54, %v1200_v6  ;;  %v1214_v17 = vmax.f32 %v1186_v3, %v1200_v6  ;;  %3343 = vmatprep.subr.bf16.mxu0 %v3933_v24  ;;  %v1440_v54 = vld [vmem:[%s4926_s3 + $0x28] sm:$0xff] }
 0x1ef   : > { %v1203_v9 = vsel %vm611_vm3, %v1198_v58, %v1202_v7  ;;  %v1212_v10 = vmax.f32 %v1184_v50, %v1201_v8  ;;  %v1215_v16 = vmax.f32 %v1187_v5, %v1202_v7  ;;  %v1438_v50 = vld [vmem:[%s4926_s3 + $0x18] sm:$0xff]  ;;  %v3347_v57 = vpack.c.bf16 %v1440_v54, %v1439_v53  ;;  %v1441_v58 = vld [vmem:[%s4926_s3 + $0x30] sm:$0xff] }
 0x1f0   : > { %v1213_v11 = vmax.f32 %v1185_v51, %v1203_v9  ;;  %v3344_v52 = vpack.c.bf16 %v1438_v50, %v1437_v47  ;;  %v3350_v60 = vpack.c.bf16 %v1442_v59, %v1441_v58  ;;  %v3329_v7 = vpack.c.bf16 %v2785_v2, %v2784_v63  ;;  %v2786_v9 = vld [vmem:[%s4926_s3 + $0x58] sm:$0xff]  ;;  %v2797_v47 = vld [vmem:[%s4926_s3 + $0xa0] sm:$0xff]  ;;  %v2811_v50 = vld [vmem:[%s4926_s3 + $0x108] sm:$0xff] }
 0x1f1   : > { %v3298_v12 = vpack.c.bf16 %v1212_v10, %v1210_v62  ;;  %v2787_v10 = vld [vmem:[%s4926_s3 + $0x60] sm:$0xff]  ;;  %v2800_v58 = vld [vmem:[%s4926_s3 + $0xb8] sm:$0xff] }
 0x1f2   : > { %v3296_v15 = vpack.c.bf16 %v1213_v11, %v1211_v4  ;;  %3345 = vmatpush3.bf16.msra.mxu0 %v3344_v52  ;;  %v2815_v2 = vld [vmem:[%s4926_s3 + $0x120] sm:$0xff] }
 0x1f3   : > { %3346 = vmatprep.subr.bf16.mxu0 %v3933_v24 }
 0x1f4   : > { %3297 = vmatprep.subr.bf16.mxu1 %v3296_v15 }
 0x1f5   : > { %3299 = vmatpush1.bf16.msra.mxu1 %v3298_v12 }
 0x1f6   : > { %2777 = vmatprep.subr.msk.mxu1 %vm611_vm3, %v1215_v16  ;;  %3348 = vmatpush3.bf16.msra.mxu0 %v3347_v57  ;;  %v3332_v16 = vpack.c.bf16 %v2787_v10, %v2786_v9  ;;  %v2799_v57 = vld [vmem:[%s4926_s3 + $0xb0] sm:$0xff]  ;;  %v2819_v9 = vld [vmem:[%s4926_s3 + $0x140] sm:$0xff]  ;;  %v2820_v10 = vld [vmem:[%s4926_s3 + $0x148] sm:$0xff] }
 0x1f7   : > { %3349 = vmatprep.subr.bf16.mxu0 %v3933_v24  ;;  %v3359_v59 = vpack.c.bf16 %v2800_v58, %v2799_v57  ;;  %v2047_v57 = vld [vmem:[#allocation10] sm:$0xff]  ;;  %v2048_v58 = vld [vmem:[#allocation10 + $0x8] sm:$0xff] }
 0x1f9   : > { %2778 = vmatpush1.msk.msra.mxu1 %vm611_vm3, %v1214_v17 }
 0x1fa   : > { %2779 = vmatmul.mubr.msk.f32.vlgmr.msra.gmra.mrb[2].mxu1 %vm1218_vm7, %v1216_v18  ;;  %3300 = vmatprep.subr.bf16.mxu1 %v3933_v24  ;;  %v2788_v18 = vld [vmem:[%s4926_s3 + $0x68] sm:$0xff] }
 0x1fb   : > { %1301 = vmatprep.mubr.f32.mxu1 %v3931_v0  ;;  %3302 = vmatpush1.bf16.msra.mxu1 %v3301_v25  ;;  %v3338_v25 = vpack.c.bf16 %v2791_v22, %v2790_v21 }
 0x1fc   : > { %3303 = vmatprep.subr.bf16.mxu1 %v3933_v24  ;;  %3351 = vmatpush3.bf16.msra.mxu0 %v3350_v60  ;;  %v2801_v60 = vld [vmem:[%s4926_s3 + $0xc0] sm:$0xff] }
 0x1fd   : > { %3008 = vmatprep.subr.mxu0 %v3931_v0 }
 0x1fe   : > { %2780 = vmatmul.mubr.msk.f32.gmra.mrb[4].mxu1 %vm1218_vm7, %v1217_v19  ;;  %v2789_v19 = vld [vmem:[%s4926_s3 + $0x70] sm:$0xff] }
 0x1ff   : > { %3305 = vmatpush1.bf16.msra.mxu1 %v3304_v27  ;;  %v3335_v20 = vpack.c.bf16 %v2789_v19, %v2788_v18  ;;  %v2805_v27 = vld [vmem:[%s4926_s3 + $0xd8] sm:$0xff] }
 0x200   : > { %3306 = vmatprep.subr.bf16.mxu1 %v3933_v24  ;;  %3009 = vmatpush3.msra.mxu0 %v1443_v61  ;;  %v3365_v29 = vpack.c.bf16 %v2806_v28, %v2805_v27  ;;  %v2802_v61 = vld [vmem:[%s4926_s3 + $0xc8] sm:$0xff] }
 0x201   : > { %3364 = vmatprep.subr.bf16.mxu0 %v3933_v24  ;;  %v3362_v63 = vpack.c.bf16 %v2802_v61, %v2801_v60  ;;  %v3410_v60 = vpack.c.bf16 %v2048_v58, %v2047_v57  ;;  %v2050_v61 = vld [vmem:[#allocation10 + $0x18] sm:$0xff]  ;;  %v2298_v57 = vld [vmem:[#allocation10 + $0xc8] sm:$0xff] }
 0x203   : > { %3308 = vmatpush1.bf16.msra.mxu1 %v3307_v30  ;;  %v2807_v30 = vld [vmem:[%s4926_s3 + $0xe8] sm:$0xff] }
 0x204   : > { %3309 = vmatprep.subr.bf16.mxu1 %v3933_v24 }
 0x207   : > { %3311 = vmatpush1.bf16.msra.mxu1 %v3310_v1  ;;  %v2795_v1 = vld [vmem:[%s4926_s3 + $0x90] sm:$0xff] }
 0x208   : > { %3312 = vmatprep.subr.bf16.mxu1 %v3933_v24  ;;  %v3353_v34 = vpack.c.bf16 %v2796_v13, %v2795_v1 }
 0x20b   : > { %3314 = vmatpush1.bf16.msra.mxu1 %v3313_v33  ;;  %v3368_v33 = vpack.c.bf16 %v2808_v31, %v2807_v30 }
 0x20c   : > { %3315 = vmatprep.subr.bf16.mxu1 %v3933_v24 }
 0x20f   : > { %3317 = vmatpush1.bf16.msra.mxu1 %v3316_v35  ;;  %v2810_v35 = vld [vmem:[%s4926_s3 + $0x100] sm:$0xff] }
 0x210   : > { %3318 = vmatprep.subr.bf16.mxu1 %v3933_v24  ;;  %v3371_v46 = vpack.c.bf16 %v2810_v35, %v2809_v23  ;;  %v1875_v35 = vld [vmem:[#allocation8] sm:$0xf] }
 0x213   : > { %3320 = vmatpush1.bf16.msra.mxu1 %v3319_v39 }
 0x214   : > { %3321 = vmatprep.subr.bf16.mxu1 %v3933_v24 }
 0x217   : > { %3323 = vmatpush1.bf16.msra.mxu1 %v3322_v42 }
 0x218   : > { %3324 = vmatprep.subr.bf16.mxu1 %v3933_v24 }
 0x21b   : > { %3327 = vmatpush1.bf16.msk.msra.mxu1 %vm3326_vm9, %v3325_v44 }
 0x21c   : > { %3328 = vmatprep.subr.bf16.mxu1 %v3933_v24 }
 0x2cd   : > { %v1297_v48 = vpop.f32.mrb[2].mxu1 }
 0x2ce   : > { %1312 = vrot.lane.b32.xlu0 %v1297_v48, %s3934_s2  ;;  %v1299_v51 = vpop.f32.mrb[3].mxu1 }
 0x2d1   : > { %v1303_v55 = vpop.f32.mrb[4].mxu1 }
 0x2d2   : > { %1314 = vrot.lane.b32.xlu0 %v1299_v51, %s3934_s2  ;;  %1316 = vrot.lane.b32.xlu1 %v1303_v55, %s3934_s2  ;;  %v1305_v56 = vpop.f32.mrb[5].mxu1 }
 0x2d6   : > { %1318 = vrot.lane.b32.xlu1 %v1305_v56, %s3934_s2  ;;  %s4987_s2 = sld [smem:[#allocation21_spill]] }
 0x2dc   : > { %s579_s16 = sand.u32 1, %s4987_s2  }
 0x2dd   : > { %s580_s15 = scalar_lea.vmem [#allocation14], %s579_s16  ;;  %s2564_s2 = scalar_lea.sflag [#allocation4], %s579_s16 }
 0x2de   : > { %s2576_s30 = sshll.u32 %s580_s15, 4  ;;  %s4883_s30 = int_to_ptr.vmem [resolvable:$true] %s2576_s30 }
 0x2df   : > { %s3842_s27 = scalar_lea.vmem %s4883_s30, 16 }
 0x2e0   : > { %p3843_p13 = scmp.ne.s32.totalorder %s4883_s30, %s3842_s27 }
 0x2e2   : > { %p3844_p6 = pnand %p3843_p13, %p4991_p1 }
 0x2e4   : > { %p3845_p9 = pneg %p3844_p6 }
 0x340   : > { %v1313_v62 = vpop.permute.xlu0 %1312 }
 0x344   : > { %v1315_v3 = vpop.permute.xlu0 %1314  ;;  %v1317_v4 = vpop.permute.xlu1 %1316 }
 0x345   : > { %v1321_v5 = vsel %vm1320_vm10, %v1313_v62, %v1315_v3  ;;  %v1328_v6 = vmax.f32 %v1299_v51, %v1315_v3  ;;  %v2812_v51 = vld [vmem:[%s4926_s3 + $0x110] sm:$0xff]  ;;  %v2813_v62 = vld [vmem:[%s4926_s3 + $0x118] sm:$0xff]  ;;  %v2816_v3 = vld [vmem:[%s4926_s3 + $0x128] sm:$0xff] }
 0x346   : > { %v1327_v8 = vmax.f32 %v1297_v48, %v1321_v5  ;;  %v2798_v48 = vld [vmem:[%s4926_s3 + $0xa8] sm:$0xff]  ;;  %v3377_v5 = vpack.c.bf16 %v2816_v3, %v2815_v2 }
 0x347   : > { %2782 = vmatprep.mubr.msk.f32.mxu1 %vm1349_vm11, %v1328_v6  ;;  %v2817_v6 = vld [vmem:[%s4926_s3 + $0x130] sm:$0xff] }
 0x348   : > { %1425 = vmatmul.mubr.f32.vlgmr.msra.gmra.mrb[6].mxu1 %v1327_v8  ;;  %v1319_v11 = vpop.permute.xlu1 %1318  ;;  %v2052_v2 = vld [vmem:[#allocation10 + $0x28] sm:$0xff] }
 0x349   : > { %v1322_v12 = vsel %vm1320_vm10, %v1317_v4, %v1319_v11  ;;  %v1330_v15 = vmax.f32 %v1305_v56, %v1319_v11  ;;  %3330 = vmatpush3.bf16.msra.mxu1 %v3329_v7  ;;  %v3374_v56 = vpack.c.bf16 %v2812_v51, %v2811_v50  ;;  %v2803_v4 = vld [vmem:[%s4926_s3 + $0xd0] sm:$0xff]  ;;  %v2818_v7 = vld [vmem:[%s4926_s3 + $0x138] sm:$0xff]  ;;  %v3383_v11 = vpack.c.bf16 %v2820_v10, %v2819_v9 }
 0x34a   : > { %v1329_v17 = vmax.f32 %v1303_v55, %v1322_v12  ;;  %3331 = vmatprep.subr.bf16.mxu1 %v3933_v24  ;;  %v3356_v55 = vpack.c.bf16 %v2798_v48, %v2797_v47  ;;  %v3380_v8 = vpack.c.bf16 %v2818_v7, %v2817_v6  ;;  %v2821_v12 = vld [vmem:[%s4926_s3 + $0x150] sm:$0xff]  ;;  %v1966_v48 = vld [vmem:[%s4931_s8 + $0x40] sm:$0xff] }
 0x34b   : > { %2783 = vmatprep.mubr.msk.f32.mxu1 %vm1349_vm11, %v1330_v15  ;;  %v2822_v15 = vld [vmem:[%s4926_s3 + $0x158] sm:$0xff]  ;;  %v1968_v51 = vld [vmem:[%s4931_s8 + $0x50] sm:$0xff] }
 0x34c   : > { %1430 = vmatmul.mubr.f32.gmra.mrb[8].mxu1 %v1329_v17  ;;  %v2823_v17 = vld [vmem:[%s4926_s3 + $0x160] sm:$0xff] }
 0x34d   : > { %3333 = vmatpush3.bf16.msra.mxu1 %v3332_v16  ;;  %2989 = vmatprep.mubr.msk.f32.mxu1 %vm3935_vm12, %v3931_v0  ;;  %v3386_v16 = vpack.c.bf16 %v2822_v15, %v2821_v12  ;;  %v2381_v12 = vld [vmem:[%s4934_s11 + $0x8] sm:$0xff]  ;;  %v2382_v15 = vld [vmem:[%s4934_s11 + $0x10] sm:$0xff] }
 0x34e   : > { %3334 = vmatprep.subr.bf16.mxu1 %v3933_v24 }
 0x351   : > { %3336 = vmatpush3.bf16.msra.mxu1 %v3335_v20 }
 0x352   : > { %3337 = vmatprep.subr.bf16.mxu1 %v3933_v24 }
 0x355   : > { %3339 = vmatpush3.bf16.msra.mxu1 %v3338_v25 }
 0x356   : > { %2987 = vmatprep.subr.mxu1 %v3931_v0 }
 0x359   : > { %2988 = vmatpush3.msra.mxu1 %v2792_v26 }
 0x35a   : > { %3352 = vmatprep.subr.bf16.mxu1 %v3933_v24 }
 0x41b   : > { %v1426_v32 = vpop.f32.mrb[6].mxu1 }
 0x41c   : > { %v1428_v14 = vpop.f32.mrb[7].mxu1  ;;  %3011 = vmatmul.mubr.msk.f32.vlgmr.msra.gmra.mrb[6].mxu0 %vm1459_vm13, %v1426_v32  ;;  %v1456_v37 = vrot.slane %v1426_v32, 1  ;;  %v1614_v38 = vrot.slane %v1426_v32, 2  ;;  %v1700_v39 = vrot.slane %v1426_v32, 3  ;;  %v1786_v40 = vrot.slane %v1426_v32, 4 }
 0x41d   : > { %3366 = vmatpush3.bf16.msra.mxu0 %v3365_v29  ;;  %3052 = vmatprep.mubr.msk.f32.mxu0 %vm3935_vm12, %v3931_v0  ;;  %v2825_v32 = vld [vmem:[%s4927_s4] ss:$0 sm:$0xff] }
 0x41e   : > { %3367 = vmatprep.subr.bf16.mxu0 %v3933_v24 }
 0x41f   : > { %v1431_v41 = vpop.f32.mrb[8].mxu1 }
 0x420   : > { %v1457_v42 = vrot.slane %v1431_v41, 1  ;;  %v1615_v36 = vrot.slane %v1431_v41, 2  ;;  %v1701_v43 = vrot.slane %v1431_v41, 3  ;;  %v1787_v44 = vrot.slane %v1431_v41, 4  ;;  %v1433_v45 = vpop.f32.mrb[9].mxu1  ;;  %v1961_v41 = vld [vmem:[%s4931_s8 + $0x18] sm:$0xff] }
 0x421   : > { %3369 = vmatpush3.bf16.msra.mxu0 %v3368_v33  ;;  %v1964_v45 = vld [vmem:[%s4931_s8 + $0x30] sm:$0xff] }
 0x422   : > { %v1458_v49 = vsel %vm611_vm3, %v1456_v37, %v1457_v42  ;;  %3370 = vmatprep.subr.bf16.mxu0 %v3933_v24  ;;  %v1702_v52 = vsel %vm938_vm6, %v1700_v39, %v1701_v43  ;;  %v1616_v53 = vsel %vm820_vm5, %v1614_v38, %v1615_v36  ;;  %v1788_v54 = vsel %vm626_vm0, %v1786_v40, %v1787_v44  ;;  %v1958_v37 = vld [vmem:[%s4931_s8] sm:$0xff]  ;;  %v1959_v38 = vld [vmem:[%s4931_s8 + $0x8] sm:$0xff]  ;;  %v1960_v39 = vld [vmem:[%s4931_s8 + $0x10] sm:$0xff] }
 0x423   : > { %2990 = vmatmul.mubr.msk.f32.vlgmr.msra.gmra.mrb[10].mxu1 %vm1459_vm13, %v1458_v49  ;;  %v3389_v40 = vpack.c.bf16 %v1959_v38, %v1958_v37  ;;  %v3392_v42 = vpack.c.bf16 %v1961_v41, %v1960_v39  ;;  %v1962_v36 = vld [vmem:[%s4931_s8 + $0x20] sm:$0xff]  ;;  %v1963_v43 = vld [vmem:[%s4931_s8 + $0x28] sm:$0xff]  ;;  %v2137_v41 = vld [vmem:[#allocation10 + $0x70] sm:$0xff] }
 0x424   : > { %3354 = vmatpush3.bf16.msra.mxu1 %v3353_v34  ;;  %3031 = vmatprep.mubr.msk.f32.mxu1 %vm3935_vm12, %v3931_v0  ;;  %v3395_v44 = vpack.c.bf16 %v1963_v43, %v1962_v36  ;;  %v1967_v49 = vld [vmem:[%s4931_s8 + $0x48] sm:$0xff] }
 0x425   : > { %3372 = vmatpush3.bf16.msra.mxu0 %v3371_v46  ;;  %3355 = vmatprep.subr.bf16.mxu1 %v3933_v24  ;;  %v1965_v46 = vld [vmem:[%s4931_s8 + $0x38] sm:$0xff]  ;;  %v3401_v50 = vpack.c.bf16 %v1967_v49, %v1966_v48  ;;  %v2135_v38 = vld [vmem:[#allocation10 + $0x60] sm:$0xff]  ;;  %v2136_v39 = vld [vmem:[#allocation10 + $0x68] sm:$0xff] }
 0x426   : > { %3373 = vmatprep.subr.bf16.mxu0 %v3933_v24  ;;  %v3398_v47 = vpack.c.bf16 %v1965_v46, %v1964_v45  ;;  %v2214_v43 = vld [vmem:[#allocation10 + $0x80] sm:$0xff]  ;;  %v2217_v48 = vld [vmem:[#allocation10 + $0x98] sm:$0xff] }
 0x428   : > { %3357 = vmatpush3.bf16.msra.mxu1 %v3356_v55  ;;  %v1971_v55 = vld [vmem:[%s4931_s8 + $0x68] sm:$0xff] }
 0x429   : > { %3375 = vmatpush3.bf16.msra.mxu0 %v3374_v56  ;;  %3358 = vmatprep.subr.bf16.mxu1 %v3933_v24 }
 0x42a   : > { %3050 = vmatprep.subr.mxu0 %v3931_v0 }
 0x42c   : > { %3360 = vmatpush3.bf16.msra.mxu1 %v3359_v59  ;;  %v2049_v59 = vld [vmem:[#allocation10 + $0x10] sm:$0xff] }
 0x42d   : > { %3051 = vmatpush3.msra.mxu0 %v2813_v62  ;;  %3361 = vmatprep.subr.bf16.mxu1 %v3933_v24  ;;  %v3413_v62 = vpack.c.bf16 %v2050_v61, %v2049_v59  ;;  %v2300_v61 = vld [vmem:[#allocation10 + $0xd8] sm:$0xff] }
 0x42e   : > { %3053 = vmatmul.mubr.msk.f32.vlgmr.msra.gmra.mrb[8].mxu0 %vm1459_vm13, %v1702_v52  ;;  %3076 = vmatprep.subr.mxu0 %v3931_v0  ;;  %v1969_v52 = vld [vmem:[%s4931_s8 + $0x58] sm:$0xff] }
 0x42f   : > { %3078 = vmatprep.mubr.msk.f32.mxu0 %vm3935_vm12, %v3931_v0 }
 0x430   : > { %3363 = vmatpush3.bf16.msra.mxu1 %v3362_v63  ;;  %v2051_v63 = vld [vmem:[#allocation10 + $0x20] sm:$0xff] }
 0x431   : > { %3029 = vmatprep.subr.mxu1 %v3931_v0  ;;  %v3416_v3 = vpack.c.bf16 %v2052_v2, %v2051_v63  ;;  %v2301_v63 = vld [vmem:[#allocation10 + $0xe0] sm:$0xff]  ;;  %v2302_v2 = vld [vmem:[#allocation10 + $0xe8] sm:$0xff] }
 0x434   : > { %3030 = vmatpush3.msra.mxu1 %v2803_v4  ;;  %v2053_v4 = vld [vmem:[#allocation10 + $0x30] sm:$0xff] }
 0x435   : > { %3032 = vmatmul.mubr.msk.f32.vlgmr.msra.gmra.mrb[12].mxu1 %vm1459_vm13, %v1616_v53  ;;  %3376 = vmatprep.subr.bf16.mxu1 %v3933_v24  ;;  %v3404_v53 = vpack.c.bf16 %v1969_v52, %v1968_v51  ;;  %v2219_v51 = vld [vmem:[#allocation10 + $0xa8] sm:$0xff] }
 0x436   : > { %3378 = vmatpush3.bf16.msra.mxu1 %v3377_v5  ;;  %3073 = vmatprep.mubr.msk.f32.mxu1 %vm3935_vm12, %v3931_v0  ;;  %v2054_v5 = vld [vmem:[#allocation10 + $0x38] sm:$0xff] }
 0x437   : > { %3379 = vmatprep.subr.bf16.mxu1 %v3933_v24 }
 0x43a   : > { %3381 = vmatpush3.bf16.msra.mxu1 %v3380_v8  ;;  %v3419_v8 = vpack.c.bf16 %v2054_v5, %v2053_v4  ;;  %v2303_v4 = vld [vmem:[#allocation10 + $0xf0] sm:$0xff]  ;;  %v2304_v5 = vld [vmem:[#allocation10 + $0xf8] sm:$0xff] }
 0x43b   : > { %3382 = vmatprep.subr.bf16.mxu1 %v3933_v24 }
 0x43e   : > { %3384 = vmatpush3.bf16.msra.mxu1 %v3383_v11  ;;  %v2380_v11 = vld [vmem:[%s4934_s11] sm:$0xff] }
 0x43f   : > { %3385 = vmatprep.subr.bf16.mxu1 %v3933_v24 }
 0x442   : > { %3387 = vmatpush3.bf16.msra.mxu1 %v3386_v16  ;;  %v3458_v16 = vpack.c.bf16 %v2381_v12, %v2380_v11  ;;  %v2394_v11 = vld [vmem:[%s4934_s11 + $0x70] sm:$0xff]  ;;  %v2046_v12 = vld [vmem:[#allocation11] sm:$0x1] }
 0x443   : > { %3071 = vmatprep.subr.mxu1 %v3931_v0 }
 0x446   : > { %3072 = vmatpush3.msra.mxu1 %v2823_v17  ;;  %v2383_v17 = vld [vmem:[%s4934_s11 + $0x18] sm:$0xff] }
 0x447   : > { %3074 = vmatmul.mubr.msk.f32.vlgmr.msra.gmra.mrb[14].mxu1 %vm1459_vm13, %v1788_v54  ;;  %3409 = vmatprep.subr.bf16.mxu1 %v3933_v24  ;;  %v1970_v54 = vld [vmem:[%s4931_s8 + $0x60] sm:$0xff] }
 0x448   : > { %3128 = vmatprep.mubr.msk.f32.mxu1 %vm3935_vm12, %v3931_v0  ;;  %v3407_v56 = vpack.c.bf16 %v1971_v55, %v1970_v54  ;;  %3411 = vmatpush3.bf16.msra.mxu1 %v3410_v60  ;;  %v2221_v54 = vld [vmem:[#allocation10 + $0xb8] sm:$0xff]  ;;  %v2299_v60 = vld [vmem:[#allocation10 + $0xd0] sm:$0xff] }
 0x449   : > { %3412 = vmatprep.subr.bf16.mxu1 %v3933_v24 }
 0x44c   : > { %3414 = vmatpush3.bf16.msra.mxu1 %v3413_v62  ;;  %v3449_v62 = vpack.c.bf16 %v2300_v61, %v2299_v60 }
 0x44d   : > { %3415 = vmatprep.subr.bf16.mxu1 %v3933_v24 }
 0x450   : > { %3417 = vmatpush3.bf16.msra.mxu1 %v3416_v3  ;;  %v3452_v3 = vpack.c.bf16 %v2302_v2, %v2301_v63 }
 0x451   : > { %3418 = vmatprep.subr.bf16.mxu1 %v3933_v24 }
 0x454   : > { %3420 = vmatpush3.bf16.msra.mxu1 %v3419_v8  ;;  %v2392_v8 = vld [vmem:[%s4934_s11 + $0x60] sm:$0xff] }
 0x455   : > { %3421 = vmatprep.subr.bf16.mxu1 %v3933_v24 }
 0x4ef   : > { %v1600_v18 = vpop.f32.mrb[6].mxu0 }
 0x4f0   : > { %v3012_v19 = vpop.f32.mrb[7].mxu0 }
 0x4f1   : > { %v2384_v19 = vld [vmem:[%s4934_s11 + $0x20] sm:$0xff] }
 0x4f6   : > { %v1528_v20 = vpop.f32.mrb[10].mxu1 }
 0x4f7   : > { %v1601_v21 = vadd.f32 %v1600_v18, %v1528_v20  ;;  %v2991_v22 = vpop.f32.mrb[11].mxu1  ;;  %v3461_v18 = vpack.c.bf16 %v2383_v17, %v2382_v15  ;;  %v2385_v20 = vld [vmem:[%s4934_s11 + $0x28] sm:$0xff]  ;;  %v2471_v15 = vld [vmem:[%s4985_s19] sm:$0xff]  ;;  %s4881_s19 = scalar_lea.hbm %s4990_s14, %s2836_s21 }
 0x4f8   : > { %v2386_v22 = vld [vmem:[%s4934_s11 + $0x30] sm:$0xff] }
 0x501   : > { %v1771_v25 = vpop.f32.mrb[8].mxu0 }
 0x502   : > { %v3054_v26 = vpop.f32.mrb[9].mxu0 }
 0x508   : > { %v1685_v27 = vpop.f32.mrb[12].mxu1 }
 0x509   : > { %v1689_v28 = vadd.f32 %v1685_v27, %v1601_v21  ;;  %v3033_v29 = vpop.f32.mrb[13].mxu1  ;;  %v3464_v21 = vpack.c.bf16 %v2385_v20, %v2384_v19  ;;  %v2388_v27 = vld [vmem:[%s4934_s11 + $0x40] sm:$0xff] }
 0x50b   : > { %v1775_v30 = vadd.f32 %v1771_v25, %v1689_v28  ;;  %v2387_v25 = vld [vmem:[%s4934_s11 + $0x38] sm:$0xff]  ;;  %v2389_v28 = vld [vmem:[%s4934_s11 + $0x48] sm:$0xff] }
 0x50c   : > { %v3467_v26 = vpack.c.bf16 %v2387_v25, %v2386_v22  ;;  %v3470_v29 = vpack.c.bf16 %v2389_v28, %v2388_v27  ;;  %v2473_v22 = vld [vmem:[%s4986_s29 + $0x10] sm:$0xff]  ;;  %v2474_v25 = vld [vmem:[%s4986_s29 + $0x18] sm:$0xff]  ;;  %v2475_v27 = vld [vmem:[%s4986_s29 + $0x20] sm:$0xff] }
 0x50d   : > { %v2476_v28 = vld [vmem:[%s4986_s29 + $0x28] sm:$0xff] }
 0x51a   : > { %v1857_v31 = vpop.f32.mrb[14].mxu1 }
 0x51b   : > { %v1861_v1 = vadd.f32 %v1857_v31, %v1775_v30  ;;  %v3075_v13 = vpop.f32.mrb[15].mxu1  ;;  %v2390_v30 = vld [vmem:[%s4934_s11 + $0x50] sm:$0xff]  ;;  %v2391_v31 = vld [vmem:[%s4934_s11 + $0x58] sm:$0xff] }
 0x51c   : > { %v2132_v13 = vld [vmem:[#allocation10 + $0x48] sm:$0xff] }
 0x51d   : > { %v1869_v14 = vadd.f32 %v2825_v32, %v1861_v1  ;;  %v3473_v32 = vpack.c.bf16 %v2391_v31, %v2390_v30  ;;  %v2131_v1 = vld [vmem:[#allocation10 + $0x40] sm:$0xff]  ;;  %v2477_v30 = vld [vmem:[%s4986_s29 + $0x30] sm:$0xff]  ;;  %v2478_v31 = vld [vmem:[%s4986_s29 + $0x38] sm:$0xff] }
 0x51f   : > { %v1870_v33 = vmax.f32 %v1869_v14, 0.0  ;;  %v3422_v14 = vpack.c.bf16 %v2132_v13, %v2131_v1  ;;  %v2479_v1 = vld [vmem:[%s4986_s29 + $0x40] sm:$0xff]  ;;  %v2480_v13 = vld [vmem:[%s4986_s29 + $0x48] sm:$0xff] }
 0x521   : > { %v1872_v34 = vrot.slane %v1870_v33, 1 }
 0x523   : > { %v1874_v23 = vmax.f32 %v1870_v33, %v1872_v34  ;;  %v2133_v33 = vld [vmem:[#allocation10 + $0x50] sm:$0xff]  ;;  %v2134_v34 = vld [vmem:[#allocation10 + $0x58] sm:$0xff] }
 0x524   : > { %v3425_v37 = vpack.c.bf16 %v2134_v34, %v2133_v33  ;;  %v2481_v33 = vld [vmem:[%s4986_s29 + $0x50] sm:$0xf] }
 0x525   : > { %3077 = vmatpush3.msk.msra.mxu0 %vm611_vm3, %v1874_v23  ;;  %vm2483_vm3 = vcmask 687104  }
 0x526   : > { %3079 = vmatmul.mubr.msk.f32.vlgmr.msra.gmra.mrb[10].mxu0 %vm1876_vm14, %v1875_v35  ;;  %3388 = vmatprep.subr.bf16.mxu0 %v3933_v24 }
 0x527   : > { %3109 = vmatprep.mubr.msk.f32.mxu0 %vm3935_vm12, %v3931_v0  ;;  %3390 = vmatpush3.bf16.msra.mxu0 %v3389_v40  ;;  %v3428_v40 = vpack.c.bf16 %v2136_v39, %v2135_v38  ;;  %v2482_v38 = vld [vmem:[%s4988_s24] sm:$0x1] }
 0x528   : > { %3391 = vmatprep.subr.bf16.mxu0 %v3933_v24 }
 0x52b   : > { %3393 = vmatpush3.bf16.msra.mxu0 %v3392_v42  ;;  %v2138_v42 = vld [vmem:[#allocation10 + $0x78] sm:$0xff] }
 0x52c   : > { %3394 = vmatprep.subr.bf16.mxu0 %v3933_v24  ;;  %v3431_v36 = vpack.c.bf16 %v2138_v42, %v2137_v41 }
 0x52f   : > { %3396 = vmatpush3.bf16.msra.mxu0 %v3395_v44  ;;  %v2215_v44 = vld [vmem:[#allocation10 + $0x88] sm:$0xff] }
 0x530   : > { %3397 = vmatprep.subr.bf16.mxu0 %v3933_v24  ;;  %v3434_v45 = vpack.c.bf16 %v2215_v44, %v2214_v43 }
 0x533   : > { %3399 = vmatpush3.bf16.msra.mxu0 %v3398_v47  ;;  %v2216_v47 = vld [vmem:[#allocation10 + $0x90] sm:$0xff] }
 0x534   : > { %3400 = vmatprep.subr.bf16.mxu0 %v3933_v24  ;;  %v3437_v49 = vpack.c.bf16 %v2217_v48, %v2216_v47 }
 0x537   : > { %3402 = vmatpush3.bf16.msra.mxu0 %v3401_v50  ;;  %v2218_v50 = vld [vmem:[#allocation10 + $0xa0] sm:$0xff] }
 0x538   : > { %3403 = vmatprep.subr.bf16.mxu0 %v3933_v24  ;;  %v3440_v52 = vpack.c.bf16 %v2219_v51, %v2218_v50 }
 0x53b   : > { %3405 = vmatpush3.bf16.msra.mxu0 %v3404_v53  ;;  %v2220_v53 = vld [vmem:[#allocation10 + $0xb0] sm:$0xff] }
 0x53c   : > { %3406 = vmatprep.subr.bf16.mxu0 %v3933_v24  ;;  %v3443_v55 = vpack.c.bf16 %v2221_v54, %v2220_v53 }
 0x53f   : > { %3408 = vmatpush3.bf16.msra.mxu0 %v3407_v56  ;;  %v2297_v56 = vld [vmem:[#allocation10 + $0xc0] sm:$0xff] }
 0x540   : > { %3457 = vmatprep.subr.bf16.mxu0 %v3933_v24  ;;  %v3446_v58 = vpack.c.bf16 %v2298_v57, %v2297_v56 }
 0x5f9   : > { %v1949_v6 = vpop.f32.mrb[10].mxu0 }
 0x5fa   : > { %1954 = vrot.lane.b32.xlu0 %v1949_v6, %s3936_s18  ;;  %v3080_v7 = vpop.f32.mrb[11].mxu0  ;;  %s3846_s18 = sshll.u32 %s3937_s22, 4  ;;  %s3847_s18 = int_to_ptr.vmem [resolvable:$false] %s3846_s18 }
 0x5fb   : > { %s3848_s17 = scalar_lea.vmem %s3847_s18, 32  ;;  %p3849_p5 = scmp.lt.s32.totalorder %s4883_s30, %s3847_s18 }
 0x5fc   : > { %p3850_p10 = scmp.lt.s32.totalorder %s3848_s17, %s3842_s27 }
 0x5fe   : > { %p3851_p0 = por %p3850_p10, %p3849_p5 }
 0x600   : > { %p3852_p2 = pnand %p3851_p0, %p3845_p9 }
 0x66c   : > { %v1955_v9 = vpop.permute.xlu0 %1954 }
 0x66d   : > { %v1957_v10 = vmax.f32 %v1949_v6, %v1955_v9  ;;  %v3455_v6 = vpack.c.bf16 %v2304_v5, %v2303_v4  ;;  %v2393_v9 = vld [vmem:[%s4934_s11 + $0x68] sm:$0xff] }
 0x66f   : > { %3110 = vmatmul.mubr.msk.f32.vlgmr.msra.gmra.mrb[12].mxu0 %vm1972_vm15, %v1957_v10  ;;  %v3476_v10 = vpack.c.bf16 %v2393_v9, %v2392_v8 }
 0x670   : > { %3218 = vmatprep.mubr.msk.f32.mxu0 %vm3935_vm12, %v3931_v0  ;;  %3459 = vmatpush3.bf16.msra.mxu0 %v3458_v16  ;;  %v2472_v16 = vld [vmem:[%s4986_s29 + $0x8] sm:$0xff] }
 0x671   : > { %3460 = vmatprep.subr.bf16.mxu0 %v3933_v24  ;;  %v3479_v20 = vpack.c.bf16 %v2472_v16, %v2471_v15 }
 0x674   : > { %3462 = vmatpush3.bf16.msra.mxu0 %v3461_v18 }
 0x675   : > { %3463 = vmatprep.subr.bf16.mxu0 %v3933_v24 }
 0x678   : > { %3465 = vmatpush3.bf16.msra.mxu0 %v3464_v21 }
 0x679   : > { %3466 = vmatprep.subr.bf16.mxu0 %v3933_v24 }
 0x67c   : > { %3468 = vmatpush3.bf16.msra.mxu0 %v3467_v26  ;;  %v3482_v26 = vpack.c.bf16 %v2474_v25, %v2473_v22 }
 0x67d   : > { %3469 = vmatprep.subr.bf16.mxu0 %v3933_v24 }
 0x680   : > { %3471 = vmatpush3.bf16.msra.mxu0 %v3470_v29  ;;  %v3485_v29 = vpack.c.bf16 %v2476_v28, %v2475_v27 }
 0x681   : > { %3472 = vmatprep.subr.bf16.mxu0 %v3933_v24 }
 0x684   : > { %3474 = vmatpush3.bf16.msra.mxu0 %v3473_v32  ;;  %v3488_v32 = vpack.c.bf16 %v2478_v31, %v2477_v30 }
 0x685   : > { %3475 = vmatprep.subr.bf16.mxu0 %v3933_v24 }
 0x688   : > { %3477 = vmatpush3.bf16.msra.mxu0 %v3476_v10 }
 0x689   : > { %3216 = vmatprep.subr.mxu0 %v3931_v0 }
 0x68c   : > { %3217 = vmatpush3.msra.mxu0 %v2394_v11 }
 0x68d   : > { %3478 = vmatprep.subr.bf16.mxu0 %v3933_v24 }
 0x742   : > { %v4794_v23 = vpop.f32.mrb[12].mxu0 }
 0x743   : > { %v3111_v35 = vpop.f32.mrb[13].mxu0  ;;  %3129 = vmatmul.mubr.msk.f32.vlgmr.msra.gmra.mrb[16].mxu1 %vm2055_vm1, %v4794_v23  ;;  %v2139_v46 = vrot.slane %v4794_v23, 1  ;;  %v2222_v59 = vrot.slane %v4794_v23, 2  ;;  %v2305_v7 = vrot.slane %v4794_v23, 3 }
 0x744   : > { %3423 = vmatpush3.bf16.msra.mxu1 %v3422_v14  ;;  %3147 = vmatprep.mubr.msk.f32.mxu1 %vm3935_vm12, %v3931_v0  ;;  %v3491_v14 = vpack.c.bf16 %v2480_v13, %v2479_v1 }
 0x745   : > { %3424 = vmatprep.subr.bf16.mxu1 %v3933_v24 }
 0x748   : > { %3426 = vmatpush3.bf16.msra.mxu1 %v3425_v37 }
 0x749   : > { %3427 = vmatprep.subr.bf16.mxu1 %v3933_v24 }
 0x74c   : > { %3429 = vmatpush3.bf16.msra.mxu1 %v3428_v40 }
 0x74d   : > { %3430 = vmatprep.subr.bf16.mxu1 %v3933_v24 }
 0x750   : > { %3432 = vmatpush3.bf16.msra.mxu1 %v3431_v36 }
 0x751   : > { %3433 = vmatprep.subr.bf16.mxu1 %v3933_v24 }
 0x753   : > { %3148 = vmatmul.mubr.msk.f32.vlgmr.msra.gmra.mrb[16].mxu1 %vm2055_vm1, %v2139_v46 }
 0x754   : > { %3435 = vmatpush3.bf16.msra.mxu1 %v3434_v45  ;;  %3166 = vmatprep.mubr.msk.f32.mxu1 %vm3935_vm12, %v3931_v0 }
 0x755   : > { %3436 = vmatprep.subr.bf16.mxu1 %v3933_v24 }
 0x758   : > { %3438 = vmatpush3.bf16.msra.mxu1 %v3437_v49 }
 0x759   : > { %3439 = vmatprep.subr.bf16.mxu1 %v3933_v24 }
 0x75c   : > { %3441 = vmatpush3.bf16.msra.mxu1 %v3440_v52 }
 0x75d   : > { %3442 = vmatprep.subr.bf16.mxu1 %v3933_v24 }
 0x760   : > { %3444 = vmatpush3.bf16.msra.mxu1 %v3443_v55 }
 0x761   : > { %3445 = vmatprep.subr.bf16.mxu1 %v3933_v24 }
 0x763   : > { %3167 = vmatmul.mubr.msk.f32.vlgmr.msra.gmra.mrb[16].mxu1 %vm2055_vm1, %v2222_v59 }
 0x764   : > { %3447 = vmatpush3.bf16.msra.mxu1 %v3446_v58  ;;  %3185 = vmatprep.mubr.msk.f32.mxu1 %vm3935_vm12, %v3931_v0 }
 0x765   : > { %3448 = vmatprep.subr.bf16.mxu1 %v3933_v24 }
 0x768   : > { %3450 = vmatpush3.bf16.msra.mxu1 %v3449_v62 }
 0x769   : > { %3451 = vmatprep.subr.bf16.mxu1 %v3933_v24 }
 0x76c   : > { %3453 = vmatpush3.bf16.msra.mxu1 %v3452_v3 }
 0x76d   : > { %3454 = vmatprep.subr.bf16.mxu1 %v3933_v24 }
 0x770   : > { %3456 = vmatpush3.bf16.msra.mxu1 %v3455_v6 }
 0x773   : > { %3186 = vmatmul.mubr.msk.f32.vlgmr.msra.gmra.mrb[16].mxu1 %vm2055_vm1, %v2305_v7 }
 0x846   : > { %v2374_v17 = vpop.f32.mrb[16].mxu1 }
 0x847   : > { %v3499_v18 = vadd.f32 %v2374_v17, %v2046_v12  ;;  %v3187_v19 = vpop.f32.mrb[17].mxu1 }
 0x849   : > { %v2379_v21 = vmax.f32 %v3499_v18, 0.0 }
 0x84b   : > { %3219 = vmatmul.mubr.msk.f32.vlgmr.msra.gmra.mrb[14].mxu0 %vm2396_vm2, %v2379_v21 }
 0x84c   : > { %3480 = vmatpush3.bf16.msra.mxu0 %v3479_v20  ;;  %3243 = vmatprep.mubr.msk.f32.mxu0 %vm3935_vm12, %v3931_v0 }
 0x84d   : > { %3481 = vmatprep.subr.bf16.mxu0 %v3933_v24 }
 0x850   : > { %3483 = vmatpush3.bf16.msra.mxu0 %v3482_v26 }
 0x851   : > { %3484 = vmatprep.subr.bf16.mxu0 %v3933_v24 }
 0x854   : > { %3486 = vmatpush3.bf16.msra.mxu0 %v3485_v29 }
 0x855   : > { %3487 = vmatprep.subr.bf16.mxu0 %v3933_v24 }
 0x858   : > { %3489 = vmatpush3.bf16.msra.mxu0 %v3488_v32 }
 0x859   : > { %3490 = vmatprep.subr.bf16.mxu0 %v3933_v24  ;;  %v2395_v24 = vld [vmem:[#allocation13] sm:$0x1] }
 0x85c   : > { %3492 = vmatpush3.bf16.msra.mxu0 %v3491_v14 }
 0x85d   : > { %3241 = vmatprep.subr.mxu0 %v3931_v0 }
 0x860   : > { %3242 = vmatpush3.msk.msra.mxu0 %vm626_vm0, %v2481_v33  ;;  %vm2561_vm0 = vcmask 73728  }
 0x91e   : > { %v2466_v34 = vpop.f32.mrb[14].mxu0 }
 0x91f   : > { %v2467_v23 = vadd.f32 %v2466_v34, %v2395_v24  ;;  %v3220_v35 = vpop.f32.mrb[15].mxu0 }
 0x921   : > { %v2470_v37 = vmax.f32 %v2467_v23, 0.0 }
 0x923   : > { %3244 = vmatmul.mubr.msk.f32.vlgmr.msra.gmra.mrb[16].mxu0 %vm2483_vm3, %v2470_v37 }
 0x9f6   : > { %v2556_v0 = vpop.f32.mrb[16].mxu0 }
 0x9f7   : > { %v2557_v39 = vadd.f32 %v2556_v0, %v2482_v38  ;;  %v3245_v40 = vpop.f32.mrb[17].mxu0 }
 0x9f9   : > { %v2560_v41 = vmax.f32 %v2557_v39, 0.0 }
 0x9fb   : > { %2562 = vst.msk [vmem:[%s580_s15] sm:$0x1] %vm2561_vm0, %v2560_v41 }
 0x9fc   : > { %3855 = shalt.err (!%p3852_p2)
}
 0x9fd   : > { %s3856_s26 = scalar_lea.hbm %s4881_s19, 16  ;;  %s3860_s20 = scalar_lea.hbm %s4990_s14, 32 }
 0x9fe   : > { %p3857_p3 = scmp.ne.s32.totalorder %s4881_s19, %s3856_s26  ;;  %p3861_p7 = scmp.lt.u32.totalorder %s4881_s19, %s4990_s14 }
 0x9ff   : > { %p3862_p8 = scmp.lt.u32.totalorder %s3860_s20, %s3856_s26  ;;  %p3864_p13 = scmp.lt.u32.totalorder %s3856_s26, %s4881_s19 }
 0xa00   : > { %p3858_p4 = pnand %p3857_p3, %p4991_p1 }
 0xa01   : > { %p3863_p11 = por %p3862_p8, %p3861_p7 }
 0xa02   : > { %p3859_p12 = pneg %p3858_p4 }
 0xa03   : > { %p3865_p6 = por %p3864_p13, %p3863_p11 }
 0xa05   : > { %p3866_p9 = pnand %p3865_p6, %p3859_p12 }
 0xa07   : > { %3869 = shalt.err (!%p3866_p9)
}
 0xa08   : > { %3556 = dma.vmem_to_hbm [thread:$0]  (%p4991_p1), %s4883_s30, 16, %s4881_s19, %s2564_s2  }
 0xa09 PF: > { %s4992_s15 = sld [smem:[#allocation23_spill]]  ;;  %s4993_s23 = sld [smem:[#allocation20_spill]] }
 0xa0a   : > { %s4994_s25 = sld [smem:[#allocation27_spill]] }
 0xa0f   : > { %p3598_p5 = scmp.ge.s32.totalorder %s4992_s15, 2  ;;  %s2588_s27 = sand.u32 1, %s4993_s23  }
 0xa10   : > { %p4995_p10 = scmp.ne.s32.totalorder %s4994_s25, 0  ;;  %s2589_s22 = scalar_lea.sflag [#allocation4], %s2588_s27 }
 0xa12   : > { %p3581_p0 = pnand %p3598_p5, %p4995_p10 }
 0xa14   : > { %3903 = dma.done.wait (!%p3581_p0), %s2589_s22, 16  }
 0xa15   : > { %3905 = vsyncadd (!%p3581_p0), %s2589_s22, 4294967280  ;;  %s4996_s21 = sld [smem:[#allocation24_spill]]  ;;  %s4997_s18 = sld [smem:[#allocation21_spill]] }
 0xa16   : > { %s4998_s19 = sld [smem:[#allocation22_spill]]  ;;  %s4999_s20 = sld [smem:[#allocation25_spill]] }
 0xa1b   : > { %p29_p2 = scmp.ge.s32.totalorder %s4996_s21, 4  }
 0xa1d   :  { %31 = sbr.rel (!%p29_p2) target bundleno = 12 (0xc), region = 155 }
 0xa24   :  { %2593 = vsyncpa [#allocation3], 1 }
 0xa25   :  { %2595 = vsyncpa [#allocation3 + $0x1], 1 }
 0xa26   :  { %2596 = vsyncpa [#allocation6], 1 }
 0xa27   :  { %2597 = vsyncpa [#allocation9], 1 }
 0xa28   :  { %2598 = vsyncpa [#allocation12], 1 }
 0xa29   :  { %2599 = vsyncpa [#allocation4], 1 }
 0xa2a   :  { %2601 = vsyncpa [#allocation4 + $0x1], 1 }

</bundles_post_ra>
